<compile_context>
chip_gen: v6e
topology: v6e:2x2x1
jax: 0.10.0
libtpu: 0.0.40
codegen_flags: <defaults>
</compile_context>

<pallas_src>
import math
import functools

import jax
import jax.numpy as jnp
from jax import lax
from jax.experimental import pallas as pl
from jax.experimental.pallas import tpu as pltpu

EPS = 1e-5  # PyTorch GroupNorm default eps


def conv_block_kernel(x_ref, wconv_ref, wproj_ref, pstat_ref, ca_ref, cbe_ref,
                      oh_ref, oht_ref, out_ref, *, p1):
    """One grid step handles a lane-dense (D, lanes) slab; lanes are contiguous
    P1-runs, one run per (batch, path2) slice."""
    d, lanes = out_ref.shape
    ksize = wconv_ref.shape[0]
    pad = (ksize - 1) // 2
    inv_cnt = 1.0 / (d * p1)

    x = x_ref[...]                                       # (D, lanes), f32 (or bf16 operands)

    # position of each lane inside its P1-run (tiny VPU work, one vreg row)
    lane_mod = lax.broadcasted_iota(jnp.int32, (1, lanes), 1) % p1

    # --- Conv1d(D, D, ksize) over Path1, all (b, p2) runs at once ---
    # in-kernel im2col: neighbour taps via lane rolls + run-boundary zero masks.
    y = jnp.dot(wconv_ref[pad], x, preferred_element_type=jnp.float32)
    for off in range(1, pad + 1):
        # x[:, t-off]  (invalid where t % p1 < off)
        xl = pltpu.roll(x, off, axis=1) * (lane_mod >= off).astype(x.dtype)
        y = y + jnp.dot(wconv_ref[pad - off], xl, preferred_element_type=jnp.float32)
        # x[:, t+off]  (invalid where t % p1 >= p1 - off)
        xr = pltpu.roll(x, lanes - off, axis=1) * (lane_mod < p1 - off).astype(x.dtype)
        y = y + jnp.dot(wconv_ref[pad + off], xr, preferred_element_type=jnp.float32)

    # --- conditional affine: Ca * conv + (Ca*b_conv + Cb); conv bias pre-folded ---
    y = ca_ref[...] * y + cbe_ref[...]

    def group_norm(v, gamma, beta):
        # GroupNorm(1, D) per P1-run: channel sums (sublane reduce), per-run
        # reduce + broadcast-back via tiny one-hot matmuls (MXU), clamped
        # single-pass variance.
        s1 = jnp.sum(v, axis=0, keepdims=True)                        # (1, lanes)
        s2 = jnp.sum(v * v, axis=0, keepdims=True)                    # (1, lanes)
        g1 = jnp.dot(s1, oh_ref[...], preferred_element_type=jnp.float32) * inv_cnt
        g2 = jnp.dot(s2, oh_ref[...], preferred_element_type=jnp.float32) * inv_cnt
        mean = jnp.dot(g1, oht_ref[...], preferred_element_type=jnp.float32)  # (1, lanes)
        ex2 = jnp.dot(g2, oht_ref[...], preferred_element_type=jnp.float32)
        var = jnp.maximum(ex2 - mean * mean, 0.0)
        return (v - mean) * lax.rsqrt(var + EPS) * gamma + beta

    # --- GroupNorm -> PReLU -> 1x1 conv -> GroupNorm ---
    y = group_norm(y, pstat_ref[:, 0:1], pstat_ref[:, 1:2])
    y = jnp.where(y >= 0.0, y, pstat_ref[:, 2:3] * y)
    y = jnp.dot(wproj_ref[...], y.astype(wproj_ref.dtype),
                preferred_element_type=jnp.float32) + pstat_ref[:, 3:4]
    y = group_norm(y, pstat_ref[:, 4:5], pstat_ref[:, 5:6])
    # TODO(synk): train-mode Dropout(p=0.1) would need pltpu.prng_seed/prng_random_bits;
    # eval mode => identity.

    # --- residual + sqrt(0.5) scale ---
    out_ref[...] = ((x.astype(jnp.float32) + y) * math.sqrt(0.5)).astype(out_ref.dtype)


def _num_parallel_lane_blocks():
    """2 on v7x (two TensorCores per chip), else 1 (v5e / v6e are single-TC)."""
    try:
        kind = jax.devices()[0].device_kind.lower()
    except Exception:
        return 1
    return 2 if ("v7" in kind or "7x" in kind) else 1


def conv_block_forward(x, c, params, *, kernel_size=3, mxu_dtype=jnp.float32):
    """x: (Batch, Path1, Path2, Dim), c: (Batch, num_condition) -> (Batch, Path2, Path1, Dim)."""
    B, P1, P2, D = x.shape
    assert kernel_size % 2 == 1, "only odd kernel_size matches PyTorch 'same' padding here"
    Ltot = B * P2 * P1

    # ---- grid shaping: one wide step on single-TC parts, 2 parallel blocks on v7x ----
    nblk = _num_parallel_lane_blocks()
    if not (Ltot % nblk == 0 and (Ltot // nblk) % P1 == 0 and (Ltot // nblk) % 128 == 0):
        nblk = 1
    lane_blk = Ltot // nblk
    Gb = lane_blk // P1                                   # (b, p2) groups per lane block

    # ---- glue: kernel-layout slab; lanes ordered (batch, path2, path1) ----
    x_slab = jnp.transpose(x, (3, 0, 2, 1)).reshape(D, Ltot).astype(mxu_dtype)

    # ---- glue: tiny conditioning Linears; fold the conv bias into the affine ----
    ca = jnp.exp(c @ params["wa"].T + params["ba"])               # (B, D)
    cb = c @ params["wb"].T + params["bb"]                        # (B, D)
    cbe = ca * params["bconv"][None, :] + cb                      # Ca*b_conv + Cb
    ca_slab = jnp.repeat(ca.T, P2 * P1, axis=1)                   # (D, Ltot), f32
    cbe_slab = jnp.repeat(cbe.T, P2 * P1, axis=1)                 # (D, Ltot), f32

    # ---- packed static per-channel parameter table (D, 8) ----
    zeros = jnp.zeros((D,), jnp.float32)
    pstat = jnp.stack([params["g1"], params["b1"], params["alpha"], params["bproj"],
                       params["g2"], params["b2"], zeros, zeros], axis=1)

    # ---- factorized GroupNorm reduce matrices (identical for every lane block) ----
    grp = jnp.arange(lane_blk) // P1
    onehot = (grp[:, None] == jnp.arange(Gb)[None, :]).astype(jnp.float32)   # (lane_blk, Gb)
    onehot_t = onehot.T                                                       # (Gb, lane_blk)

    wconv = params["wconv"].astype(mxu_dtype)             # (k, D_out, D_in)
    wproj = params["wproj"].astype(mxu_dtype)             # (D, D)

    kernel = functools.partial(conv_block_kernel, p1=P1)

    out = pl.pallas_call(
        kernel,
        out_shape=jax.ShapeDtypeStruct((D, Ltot), jnp.float32),
        grid=(nblk,),
        in_specs=[
            pl.BlockSpec((D, lane_blk), lambda i: (0, i)),            # x slab (conv in + residual)
            pl.BlockSpec((kernel_size, D, D), lambda i: (0, 0, 0)),   # conv taps
            pl.BlockSpec((D, D), lambda i: (0, 0)),                   # 1x1 conv weight
            pl.BlockSpec((D, 8), lambda i: (0, 0)),                   # packed static params
            pl.BlockSpec((D, lane_blk), lambda i: (0, i)),            # Ca slab
            pl.BlockSpec((D, lane_blk), lambda i: (0, i)),            # Ca*b_conv + Cb slab
            pl.BlockSpec((lane_blk, Gb), lambda i: (0, 0)),           # group one-hot
            pl.BlockSpec((Gb, lane_blk), lambda i: (0, 0)),           # group one-hot transposed
        ],
        out_specs=pl.BlockSpec((D, lane_blk), lambda i: (0, i)),
        compiler_params=pltpu.CompilerParams(
            dimension_semantics=("parallel",)),
        # NOTE: at production D/P1/P2 re-derive lane_blk against VMEM (v7x: 64 MiB
        # physical / 32 MiB scoped default) and set vmem_limit_bytes explicitly.
    )(x_slab, wconv, wproj, pstat, ca_slab, cbe_slab, onehot, onehot_t)

    # glue: (D, B*P2*P1) -> (B, P2, P1, D)   (== X.transpose(2, 3) in the reference)
    return jnp.transpose(out.reshape(D, B, P2, P1), (1, 2, 3, 0))


def conv_block_reference(x, c, params, *, kernel_size=3):
    """Pure-JAX reference of the same forward pass (independent conv lowering)."""
    B, P1, P2, D = x.shape
    pad = (kernel_size - 1) // 2
    xp = jnp.transpose(x, (0, 2, 3, 1))                       # (B, P2, D, P1)
    xf = xp.reshape(B * P2, D, P1)

    w_oik = jnp.transpose(params["wconv"], (1, 2, 0))         # (D_out, D_in, k)
    conv = lax.conv_general_dilated(xf, w_oik, window_strides=(1,),
                                    padding=[(pad, pad)],
                                    dimension_numbers=("NCH", "OIH", "NCH"))
    conv = conv + params["bconv"][None, :, None]

    ca = jnp.exp(c @ params["wa"].T + params["ba"])           # (B, D)
    cb = c @ params["wb"].T + params["bb"]
    y = ca[:, None, :, None] * conv.reshape(B, P2, D, P1) + cb[:, None, :, None]
    y = y.reshape(B * P2, D, P1)

    def gn(v, g, b):
        m = v.mean(axis=(1, 2), keepdims=True)
        va = ((v - m) ** 2).mean(axis=(1, 2), keepdims=True)
        return (v - m) * lax.rsqrt(va + EPS) * g[None, :, None] + b[None, :, None]

    y = gn(y, params["g1"], params["b1"])
    y = jnp.where(y >= 0.0, y, params["alpha"][None, :, None] * y)
    y = jnp.einsum("oi,nil->nol", params["wproj"], y) + params["bproj"][None, :, None]
    y = gn(y, params["g2"], params["b2"])

    out = (xp + y.reshape(B, P2, D, P1)) * math.sqrt(0.5)
    return jnp.transpose(out, (0, 1, 3, 2))


def make_params(key, num_hidden, num_condition, kernel_size=3):
    ks = jax.random.split(key, 8)
    D, C = num_hidden, num_condition
    return {
        "wconv": 0.1 * jax.random.normal(ks[0], (kernel_size, D, D), jnp.float32),  # [k, out, in]
        "bconv": 0.05 * jax.random.normal(ks[1], (D,), jnp.float32),
        "wproj": 0.1 * jax.random.normal(ks[2], (D, D), jnp.float32),
        "bproj": 0.05 * jax.random.normal(ks[3], (D,), jnp.float32),
        "g1": jnp.ones((D,), jnp.float32), "b1": jnp.zeros((D,), jnp.float32),
        "g2": jnp.ones((D,), jnp.float32), "b2": jnp.zeros((D,), jnp.float32),
        "alpha": jnp.full((D,), 0.2, jnp.float32),                                   # PReLU init=0.2
        "wa": 0.1 * jax.random.normal(ks[4], (D, C), jnp.float32),
        "ba": 0.05 * jax.random.normal(ks[5], (D,), jnp.float32),
        "wb": 0.1 * jax.random.normal(ks[6], (D, C), jnp.float32),
        "bb": 0.05 * jax.random.normal(ks[7], (D,), jnp.float32),
    }


if __name__ == "__main__":
    B, P1, P2, D = 2, 16, 8, 32
    num_condition = 16

    key = jax.random.PRNGKey(0)
    kx, kc, kp = jax.random.split(key, 3)
    x = jax.random.normal(kx, (B, P1, P2, D), jnp.float32)
    c = jax.random.normal(kc, (B, num_condition), jnp.float32)
    params = make_params(kp, D, num_condition)

    # jit so the thin layout glue around the kernel fuses and dispatches once.
    fwd = jax.jit(functools.partial(conv_block_forward, kernel_size=3))
    out = jax.block_until_ready(fwd(x, c, params))

    ref = conv_block_reference(x, c, params)
    assert out.shape == (B, P2, P1, D), out.shape
    max_err = float(jnp.max(jnp.abs(out - ref)))
    assert max_err < 1e-4, f"mismatch vs reference: {max_err}"

    print("KERNEL_OK")
</pallas_src>

<mosaic_0001>
module attributes {stable_mosaic.version = 11 : i64} {
  func.func @conv_block_kernel(%arg0: i32, %arg1: memref<32x256xf32, #tpu.memory_space<vmem>>, %arg2: memref<3x32x32xf32, #tpu.memory_space<vmem>>, %arg3: memref<32x32xf32, #tpu.memory_space<vmem>>, %arg4: memref<32x8xf32, #tpu.memory_space<vmem>>, %arg5: memref<32x256xf32, #tpu.memory_space<vmem>>, %arg6: memref<32x256xf32, #tpu.memory_space<vmem>>, %arg7: memref<256x16xf32, #tpu.memory_space<vmem>>, %arg8: memref<16x256xf32, #tpu.memory_space<vmem>>, %arg9: memref<32x256xf32, #tpu.memory_space<vmem>>) attributes {dimension_semantics = [#tpu.dimension_semantics<parallel>], iteration_bounds = array<i64: 1>, scalar_prefetch = 0 : i64, scratch_operands = 0 : i64, tpu.core_type = #tpu.core_type<tc>, window_params = [{transform_indices = @transform_0, window_bounds = array<i64: 32, 256>}, {pipeline_mode = #tpu.pipeline_mode<synchronous>, transform_indices = @transform_1, window_bounds = array<i64: 3, 32, 32>}, {pipeline_mode = #tpu.pipeline_mode<synchronous>, transform_indices = @transform_2, window_bounds = array<i64: 32, 32>}, {pipeline_mode = #tpu.pipeline_mode<synchronous>, transform_indices = @transform_3, window_bounds = array<i64: 32, 8>}, {transform_indices = @transform_4, window_bounds = array<i64: 32, 256>}, {transform_indices = @transform_5, window_bounds = array<i64: 32, 256>}, {pipeline_mode = #tpu.pipeline_mode<synchronous>, transform_indices = @transform_6, window_bounds = array<i64: 256, 16>}, {pipeline_mode = #tpu.pipeline_mode<synchronous>, transform_indices = @transform_7, window_bounds = array<i64: 16, 256>}, {transform_indices = @transform_8, window_bounds = array<i64: 32, 256>}]} {
    %c0 = arith.constant 0 : index
    %c0_0 = arith.constant 0 : index
    %0 = vector.load %arg1[%c0, %c0_0] : memref<32x256xf32, #tpu.memory_space<vmem>>, vector<32x256xf32>
    %1 = tpu.iota {dimensions = array<i32: 1>} : vector<1x256xi32>
    %c16_i32 = arith.constant 16 : i32
    %c0_i32 = arith.constant 0 : i32
    %2 = arith.cmpi eq, %c16_i32, %c0_i32 : i32
    %c1_i32 = arith.constant 1 : i32
    %3 = arith.select %2, %c1_i32, %c16_i32 : i32
    %4 = vector.broadcast %3 : i32 to vector<1x256xi32>
    %5 = arith.remsi %1, %4 : vector<1x256xi32>
    %c0_i32_1 = arith.constant 0 : i32
    %6 = vector.broadcast %c0_i32_1 : i32 to vector<1x256xi32>
    %7 = arith.cmpi ne, %5, %6 : vector<1x256xi32>
    %c0_i32_2 = arith.constant 0 : i32
    %8 = vector.broadcast %c0_i32_2 : i32 to vector<1x256xi32>
    %9 = arith.cmpi slt, %5, %8 : vector<1x256xi32>
    %c0_i32_3 = arith.constant 0 : i32
    %10 = arith.cmpi slt, %3, %c0_i32_3 : i32
    %11 = vector.broadcast %10 : i1 to vector<1x256xi1>
    %12 = vector.broadcast %11 : vector<1x256xi1> to vector<1x256xi1>
    %13 = arith.xori %9, %12 : vector<1x256xi1>
    %14 = arith.andi %13, %7 : vector<1x256xi1>
    %15 = vector.broadcast %3 : i32 to vector<1x256xi32>
    %16 = arith.addi %5, %15 : vector<1x256xi32>
    %17 = arith.select %14, %16, %5 : vector<1x256xi1>, vector<1x256xi32>
    %c1 = arith.constant 1 : index
    %c0_4 = arith.constant 0 : index
    %c0_5 = arith.constant 0 : index
    %18 = vector.load %arg2[%c1, %c0_4, %c0_5] : memref<3x32x32xf32, #tpu.memory_space<vmem>>, vector<1x32x32xf32>
    %19 = vector.shape_cast %18 : vector<1x32x32xf32> to vector<32x32xf32>
    %cst = arith.constant dense<0.000000e+00> : vector<32x256xf32>
    %20 = tpu.matmul %19, %0, %cst {dimension_numbers = #tpu.dot_dimension_numbers<[1], [0], [0], [1], [0, 0, 1, 1], [], []>} : vector<32x32xf32>, vector<32x256xf32>, vector<32x256xf32> -> vector<32x256xf32>
    %c1_i32_6 = arith.constant 1 : i32
    %21 = tpu.dynamic_rotate %0 by %c1_i32_6 dim 1 : vector<32x256xf32>, i32 -> vector<32x256xf32>
    %c1_i32_7 = arith.constant 1 : i32
    %22 = vector.broadcast %c1_i32_7 : i32 to vector<1x256xi32>
    %23 = arith.cmpi sge, %17, %22 : vector<1x256xi32>
    %24 = arith.extui %23 : vector<1x256xi1> to vector<1x256xi32>
    %25 = arith.sitofp %24 : vector<1x256xi32> to vector<1x256xf32>
    %26 = vector.broadcast %25 : vector<1x256xf32> to vector<32x256xf32>
    %27 = arith.mulf %21, %26 : vector<32x256xf32>
    %c0_8 = arith.constant 0 : index
    %c0_9 = arith.constant 0 : index
    %c0_10 = arith.constant 0 : index
    %28 = vector.load %arg2[%c0_8, %c0_9, %c0_10] : memref<3x32x32xf32, #tpu.memory_space<vmem>>, vector<1x32x32xf32>
    %29 = vector.shape_cast %28 : vector<1x32x32xf32> to vector<32x32xf32>
    %cst_11 = arith.constant dense<0.000000e+00> : vector<32x256xf32>
    %30 = tpu.matmul %29, %27, %cst_11 {dimension_numbers = #tpu.dot_dimension_numbers<[1], [0], [0], [1], [0, 0, 1, 1], [], []>} : vector<32x32xf32>, vector<32x256xf32>, vector<32x256xf32> -> vector<32x256xf32>
    %31 = arith.addf %20, %30 : vector<32x256xf32>
    %c255_i32 = arith.constant 255 : i32
    %32 = tpu.dynamic_rotate %0 by %c255_i32 dim 1 : vector<32x256xf32>, i32 -> vector<32x256xf32>
    %c15_i32 = arith.constant 15 : i32
    %33 = vector.broadcast %c15_i32 : i32 to vector<1x256xi32>
    %34 = arith.cmpi slt, %17, %33 : vector<1x256xi32>
    %35 = arith.extui %34 : vector<1x256xi1> to vector<1x256xi32>
    %36 = arith.sitofp %35 : vector<1x256xi32> to vector<1x256xf32>
    %37 = vector.broadcast %36 : vector<1x256xf32> to vector<32x256xf32>
    %38 = arith.mulf %32, %37 : vector<32x256xf32>
    %c2 = arith.constant 2 : index
    %c0_12 = arith.constant 0 : index
    %c0_13 = arith.constant 0 : index
    %39 = vector.load %arg2[%c2, %c0_12, %c0_13] : memref<3x32x32xf32, #tpu.memory_space<vmem>>, vector<1x32x32xf32>
    %40 = vector.shape_cast %39 : vector<1x32x32xf32> to vector<32x32xf32>
    %cst_14 = arith.constant dense<0.000000e+00> : vector<32x256xf32>
    %41 = tpu.matmul %40, %38, %cst_14 {dimension_numbers = #tpu.dot_dimension_numbers<[1], [0], [0], [1], [0, 0, 1, 1], [], []>} : vector<32x32xf32>, vector<32x256xf32>, vector<32x256xf32> -> vector<32x256xf32>
    %42 = arith.addf %31, %41 : vector<32x256xf32>
    %c0_15 = arith.constant 0 : index
    %c0_16 = arith.constant 0 : index
    %43 = vector.load %arg5[%c0_15, %c0_16] : memref<32x256xf32, #tpu.memory_space<vmem>>, vector<32x256xf32>
    %44 = arith.mulf %43, %42 : vector<32x256xf32>
    %c0_17 = arith.constant 0 : index
    %c0_18 = arith.constant 0 : index
    %45 = vector.load %arg6[%c0_17, %c0_18] : memref<32x256xf32, #tpu.memory_space<vmem>>, vector<32x256xf32>
    %46 = arith.addf %44, %45 : vector<32x256xf32>
    %c0_19 = arith.constant 0 : index
    %c0_20 = arith.constant 0 : index
    %47 = vector.load %arg4[%c0_19, %c0_20] : memref<32x8xf32, #tpu.memory_space<vmem>>, vector<32x1xf32>
    %c0_21 = arith.constant 0 : index
    %c1_22 = arith.constant 1 : index
    %48 = vector.load %arg4[%c0_21, %c1_22] : memref<32x8xf32, #tpu.memory_space<vmem>>, vector<32x1xf32>
    %cst_23 = arith.constant dense<0.000000e+00> : vector<256xf32>
    %49 = vector.multi_reduction <add>, %46, %cst_23 [0] : vector<32x256xf32> to vector<256xf32>
    %50 = vector.shape_cast %49 : vector<256xf32> to vector<1x256xf32>
    %51 = arith.mulf %46, %46 : vector<32x256xf32>
    %cst_24 = arith.constant dense<0.000000e+00> : vector<256xf32>
    %52 = vector.multi_reduction <add>, %51, %cst_24 [0] : vector<32x256xf32> to vector<256xf32>
    %53 = vector.shape_cast %52 : vector<256xf32> to vector<1x256xf32>
    %c0_25 = arith.constant 0 : index
    %c0_26 = arith.constant 0 : index
    %54 = vector.load %arg7[%c0_25, %c0_26] : memref<256x16xf32, #tpu.memory_space<vmem>>, vector<256x16xf32>
    %cst_27 = arith.constant dense<0.000000e+00> : vector<1x16xf32>
    %55 = tpu.matmul %50, %54, %cst_27 {dimension_numbers = #tpu.dot_dimension_numbers<[1], [0], [0], [1], [0, 0, 1, 1], [], []>} : vector<1x256xf32>, vector<256x16xf32>, vector<1x16xf32> -> vector<1x16xf32>
    %cst_28 = arith.constant 0.001953125 : f32
    %56 = vector.broadcast %cst_28 : f32 to vector<1x16xf32>
    %57 = arith.mulf %55, %56 : vector<1x16xf32>
    %c0_29 = arith.constant 0 : index
    %c0_30 = arith.constant 0 : index
    %58 = vector.load %arg7[%c0_29, %c0_30] : memref<256x16xf32, #tpu.memory_space<vmem>>, vector<256x16xf32>
    %cst_31 = arith.constant dense<0.000000e+00> : vector<1x16xf32>
    %59 = tpu.matmul %53, %58, %cst_31 {dimension_numbers = #tpu.dot_dimension_numbers<[1], [0], [0], [1], [0, 0, 1, 1], [], []>} : vector<1x256xf32>, vector<256x16xf32>, vector<1x16xf32> -> vector<1x16xf32>
    %cst_32 = arith.constant 0.001953125 : f32
    %60 = vector.broadcast %cst_32 : f32 to vector<1x16xf32>
    %61 = arith.mulf %59, %60 : vector<1x16xf32>
    %c0_33 = arith.constant 0 : index
    %c0_34 = arith.constant 0 : index
    %62 = vector.load %arg8[%c0_33, %c0_34] : memref<16x256xf32, #tpu.memory_space<vmem>>, vector<16x256xf32>
    %cst_35 = arith.constant dense<0.000000e+00> : vector<1x256xf32>
    %63 = tpu.matmul %57, %62, %cst_35 {dimension_numbers = #tpu.dot_dimension_numbers<[1], [0], [0], [1], [0, 0, 1, 1], [], []>} : vector<1x16xf32>, vector<16x256xf32>, vector<1x256xf32> -> vector<1x256xf32>
    %c0_36 = arith.constant 0 : index
    %c0_37 = arith.constant 0 : index
    %64 = vector.load %arg8[%c0_36, %c0_37] : memref<16x256xf32, #tpu.memory_space<vmem>>, vector<16x256xf32>
    %cst_38 = arith.constant dense<0.000000e+00> : vector<1x256xf32>
    %65 = tpu.matmul %61, %64, %cst_38 {dimension_numbers = #tpu.dot_dimension_numbers<[1], [0], [0], [1], [0, 0, 1, 1], [], []>} : vector<1x16xf32>, vector<16x256xf32>, vector<1x256xf32> -> vector<1x256xf32>
    %66 = arith.mulf %63, %63 : vector<1x256xf32>
    %67 = arith.subf %65, %66 : vector<1x256xf32>
    %cst_39 = arith.constant 0.000000e+00 : f32
    %68 = vector.broadcast %cst_39 : f32 to vector<1x256xf32>
    %69 = arith.maximumf %67, %68 : vector<1x256xf32>
    %70 = vector.broadcast %63 : vector<1x256xf32> to vector<32x256xf32>
    %71 = arith.subf %46, %70 : vector<32x256xf32>
    %cst_40 = arith.constant 9.99999974E-6 : f32
    %72 = vector.broadcast %cst_40 : f32 to vector<1x256xf32>
    %73 = arith.addf %69, %72 : vector<1x256xf32>
    %74 = math.rsqrt %73 : vector<1x256xf32>
    %75 = vector.broadcast %74 : vector<1x256xf32> to vector<32x256xf32>
    %76 = arith.mulf %71, %75 : vector<32x256xf32>
    %77 = vector.broadcast %47 : vector<32x1xf32> to vector<32x256xf32>
    %78 = arith.mulf %76, %77 : vector<32x256xf32>
    %79 = vector.broadcast %48 : vector<32x1xf32> to vector<32x256xf32>
    %80 = arith.addf %78, %79 : vector<32x256xf32>
    %cst_41 = arith.constant 0.000000e+00 : f32
    %81 = vector.broadcast %cst_41 : f32 to vector<32x256xf32>
    %82 = arith.cmpf oge, %80, %81 : vector<32x256xf32>
    %c0_42 = arith.constant 0 : index
    %c2_43 = arith.constant 2 : index
    %83 = vector.load %arg4[%c0_42, %c2_43] : memref<32x8xf32, #tpu.memory_space<vmem>>, vector<32x1xf32>
    %84 = vector.broadcast %83 : vector<32x1xf32> to vector<32x256xf32>
    %85 = arith.mulf %84, %80 : vector<32x256xf32>
    %86 = arith.select %82, %80, %85 : vector<32x256xi1>, vector<32x256xf32>
    %c0_44 = arith.constant 0 : index
    %c0_45 = arith.constant 0 : index
    %87 = vector.load %arg3[%c0_44, %c0_45] : memref<32x32xf32, #tpu.memory_space<vmem>>, vector<32x32xf32>
    %cst_46 = arith.constant dense<0.000000e+00> : vector<32x256xf32>
    %88 = tpu.matmul %87, %86, %cst_46 {dimension_numbers = #tpu.dot_dimension_numbers<[1], [0], [0], [1], [0, 0, 1, 1], [], []>} : vector<32x32xf32>, vector<32x256xf32>, vector<32x256xf32> -> vector<32x256xf32>
    %c0_47 = arith.constant 0 : index
    %c3 = arith.constant 3 : index
    %89 = vector.load %arg4[%c0_47, %c3] : memref<32x8xf32, #tpu.memory_space<vmem>>, vector<32x1xf32>
    %90 = vector.broadcast %89 : vector<32x1xf32> to vector<32x256xf32>
    %91 = arith.addf %88, %90 : vector<32x256xf32>
    %c0_48 = arith.constant 0 : index
    %c4 = arith.constant 4 : index
    %92 = vector.load %arg4[%c0_48, %c4] : memref<32x8xf32, #tpu.memory_space<vmem>>, vector<32x1xf32>
    %c0_49 = arith.constant 0 : index
    %c5 = arith.constant 5 : index
    %93 = vector.load %arg4[%c0_49, %c5] : memref<32x8xf32, #tpu.memory_space<vmem>>, vector<32x1xf32>
    %cst_50 = arith.constant dense<0.000000e+00> : vector<256xf32>
    %94 = vector.multi_reduction <add>, %91, %cst_50 [0] : vector<32x256xf32> to vector<256xf32>
    %95 = vector.shape_cast %94 : vector<256xf32> to vector<1x256xf32>
    %96 = arith.mulf %91, %91 : vector<32x256xf32>
    %cst_51 = arith.constant dense<0.000000e+00> : vector<256xf32>
    %97 = vector.multi_reduction <add>, %96, %cst_51 [0] : vector<32x256xf32> to vector<256xf32>
    %98 = vector.shape_cast %97 : vector<256xf32> to vector<1x256xf32>
    %c0_52 = arith.constant 0 : index
    %c0_53 = arith.constant 0 : index
    %99 = vector.load %arg7[%c0_52, %c0_53] : memref<256x16xf32, #tpu.memory_space<vmem>>, vector<256x16xf32>
    %cst_54 = arith.constant dense<0.000000e+00> : vector<1x16xf32>
    %100 = tpu.matmul %95, %99, %cst_54 {dimension_numbers = #tpu.dot_dimension_numbers<[1], [0], [0], [1], [0, 0, 1, 1], [], []>} : vector<1x256xf32>, vector<256x16xf32>, vector<1x16xf32> -> vector<1x16xf32>
    %cst_55 = arith.constant 0.001953125 : f32
    %101 = vector.broadcast %cst_55 : f32 to vector<1x16xf32>
    %102 = arith.mulf %100, %101 : vector<1x16xf32>
    %c0_56 = arith.constant 0 : index
    %c0_57 = arith.constant 0 : index
    %103 = vector.load %arg7[%c0_56, %c0_57] : memref<256x16xf32, #tpu.memory_space<vmem>>, vector<256x16xf32>
    %cst_58 = arith.constant dense<0.000000e+00> : vector<1x16xf32>
    %104 = tpu.matmul %98, %103, %cst_58 {dimension_numbers = #tpu.dot_dimension_numbers<[1], [0], [0], [1], [0, 0, 1, 1], [], []>} : vector<1x256xf32>, vector<256x16xf32>, vector<1x16xf32> -> vector<1x16xf32>
    %cst_59 = arith.constant 0.001953125 : f32
    %105 = vector.broadcast %cst_59 : f32 to vector<1x16xf32>
    %106 = arith.mulf %104, %105 : vector<1x16xf32>
    %c0_60 = arith.constant 0 : index
    %c0_61 = arith.constant 0 : index
    %107 = vector.load %arg8[%c0_60, %c0_61] : memref<16x256xf32, #tpu.memory_space<vmem>>, vector<16x256xf32>
    %cst_62 = arith.constant dense<0.000000e+00> : vector<1x256xf32>
    %108 = tpu.matmul %102, %107, %cst_62 {dimension_numbers = #tpu.dot_dimension_numbers<[1], [0], [0], [1], [0, 0, 1, 1], [], []>} : vector<1x16xf32>, vector<16x256xf32>, vector<1x256xf32> -> vector<1x256xf32>
    %c0_63 = arith.constant 0 : index
    %c0_64 = arith.constant 0 : index
    %109 = vector.load %arg8[%c0_63, %c0_64] : memref<16x256xf32, #tpu.memory_space<vmem>>, vector<16x256xf32>
    %cst_65 = arith.constant dense<0.000000e+00> : vector<1x256xf32>
    %110 = tpu.matmul %106, %109, %cst_65 {dimension_numbers = #tpu.dot_dimension_numbers<[1], [0], [0], [1], [0, 0, 1, 1], [], []>} : vector<1x16xf32>, vector<16x256xf32>, vector<1x256xf32> -> vector<1x256xf32>
    %111 = arith.mulf %108, %108 : vector<1x256xf32>
    %112 = arith.subf %110, %111 : vector<1x256xf32>
    %cst_66 = arith.constant 0.000000e+00 : f32
    %113 = vector.broadcast %cst_66 : f32 to vector<1x256xf32>
    %114 = arith.maximumf %112, %113 : vector<1x256xf32>
    %115 = vector.broadcast %108 : vector<1x256xf32> to vector<32x256xf32>
    %116 = arith.subf %91, %115 : vector<32x256xf32>
    %cst_67 = arith.constant 9.99999974E-6 : f32
    %117 = vector.broadcast %cst_67 : f32 to vector<1x256xf32>
    %118 = arith.addf %114, %117 : vector<1x256xf32>
    %119 = math.rsqrt %118 : vector<1x256xf32>
    %120 = vector.broadcast %119 : vector<1x256xf32> to vector<32x256xf32>
    %121 = arith.mulf %116, %120 : vector<32x256xf32>
    %122 = vector.broadcast %92 : vector<32x1xf32> to vector<32x256xf32>
    %123 = arith.mulf %121, %122 : vector<32x256xf32>
    %124 = vector.broadcast %93 : vector<32x1xf32> to vector<32x256xf32>
    %125 = arith.addf %123, %124 : vector<32x256xf32>
    %126 = arith.addf %0, %125 : vector<32x256xf32>
    %cst_68 = arith.constant 0.707106769 : f32
    %127 = vector.broadcast %cst_68 : f32 to vector<32x256xf32>
    %128 = arith.mulf %126, %127 : vector<32x256xf32>
    %c0_69 = arith.constant 0 : index
    %c0_70 = arith.constant 0 : index
    %129 = vector.load %arg9[%c0_69, %c0_70] : memref<32x256xf32, #tpu.memory_space<vmem>>, vector<32x256xf32>
    tpu.vector_store %arg9[%c0_69, %c0_70], %128 {strides = array<i32>} : memref<32x256xf32, #tpu.memory_space<vmem>>, vector<32x256xf32>,
    return
  }
  func.func @transform_0(%arg0: i32) -> (i32, i32) {
    %c0_i32 = arith.constant 0 : i32
    %c0_i32_0 = arith.constant 0 : i32
    return %c0_i32, %arg0 : i32, i32
  }
  func.func @transform_1(%arg0: i32) -> (i32, i32, i32) {
    %c0_i32 = arith.constant 0 : i32
    %c0_i32_0 = arith.constant 0 : i32
    %c0_i32_1 = arith.constant 0 : i32
    %c0_i32_2 = arith.constant 0 : i32
    return %c0_i32, %c0_i32_0, %c0_i32_1 : i32, i32, i32
  }
  func.func @transform_2(%arg0: i32) -> (i32, i32) {
    %c0_i32 = arith.constant 0 : i32
    %c0_i32_0 = arith.constant 0 : i32
    %c0_i32_1 = arith.constant 0 : i32
    return %c0_i32, %c0_i32_0 : i32, i32
  }
  func.func @transform_3(%arg0: i32) -> (i32, i32) {
    %c0_i32 = arith.constant 0 : i32
    %c0_i32_0 = arith.constant 0 : i32
    %c0_i32_1 = arith.constant 0 : i32
    return %c0_i32, %c0_i32_0 : i32, i32
  }
  func.func @transform_4(%arg0: i32) -> (i32, i32) {
    %c0_i32 = arith.constant 0 : i32
    %c0_i32_0 = arith.constant 0 : i32
    return %c0_i32, %arg0 : i32, i32
  }
  func.func @transform_5(%arg0: i32) -> (i32, i32) {
    %c0_i32 = arith.constant 0 : i32
    %c0_i32_0 = arith.constant 0 : i32
    return %c0_i32, %arg0 : i32, i32
  }
  func.func @transform_6(%arg0: i32) -> (i32, i32) {
    %c0_i32 = arith.constant 0 : i32
    %c0_i32_0 = arith.constant 0 : i32
    %c0_i32_1 = arith.constant 0 : i32
    return %c0_i32, %c0_i32_0 : i32, i32
  }
  func.func @transform_7(%arg0: i32) -> (i32, i32) {
    %c0_i32 = arith.constant 0 : i32
    %c0_i32_0 = arith.constant 0 : i32
    %c0_i32_1 = arith.constant 0 : i32
    return %c0_i32, %c0_i32_0 : i32, i32
  }
  func.func @transform_8(%arg0: i32) -> (i32, i32) {
    %c0_i32 = arith.constant 0 : i32
    %c0_i32_0 = arith.constant 0 : i32
    return %c0_i32, %arg0 : i32, i32
  }
}

</mosaic_0001>

<bundles_post_ra>
// kernel: conv_block_forward.1
= control target key start
LH: loop header
LB: loop body
LE: loop exit
PB: predicated region body
PF: predicated region fallthrough
CT: control target
= control target key end

     0   :  { %v2582_v2 = vmov 0.0   ;;  %s1793_s9 = smov 1   ;;  %vm112_vm0 = vcmask 261120   ;;  %s1794_s26 = smov 127   ;;  %v2581_v13 = vlaneseq  ;;  %vm726_vm7 = vcmask 130048   ;;  %s2572_s0 = inlined_call_operand.vmem [shape: f32[32,256], index: 0, kind: input, shape index: {}]   ;;  %s2573_s1 = inlined_call_operand.vmem [shape: f32[3,32,32], index: 1, kind: input, shape index: {}]   ;;  %s2574_s6 = inlined_call_operand.vmem [shape: f32[256,16], index: 6, kind: input, shape index: {}]   ;;  %s2575_s4 = inlined_call_operand.vmem [shape: f32[32,256], index: 4, kind: input, shape index: {}]   ;;  %s2576_s5 = inlined_call_operand.vmem [shape: f32[32,256], index: 5, kind: input, shape index: {}]   ;;  %s2577_s7 = inlined_call_operand.vmem [shape: f32[16,256], index: 7, kind: input, shape index: {}]   ;;  %s2578_s3 = inlined_call_operand.vmem [shape: f32[32,8], index: 3, kind: input, shape index: {}]   ;;  %s2579_s2 = inlined_call_operand.vmem [shape: f32[32,32], index: 2, kind: input, shape index: {}]   ;;  %s2580_s8 = inlined_call_operand.vmem [shape: f32[32,256], index: 8, kind: output, shape index: {}]  }
   0x1   :  { %v35_v0 = vld [vmem:[%s2572_s0 + $0x30] sm:$0xff]  ;;  %v33_v1 = vld [vmem:[%s2572_s0 + $0x20] sm:$0xff]  ;;  %189 = vmatprep.mubr.f32.mxu0 %v2582_v2  ;;  %290 = vmatprep.mubr.f32.mxu1 %v2582_v2  ;;  %v36_v3 = vld [vmem:[%s2572_s0 + $0x38] sm:$0xff] }
   0x2   :  { %75 = vrot.lane.b32.xlu0 %v35_v0, %s1793_s9  ;;  %73 = vrot.lane.b32.xlu1 %v33_v1, %s1793_s9  ;;  %v34_v4 = vld [vmem:[%s2572_s0 + $0x28] sm:$0xff]  ;;  %v32_v5 = vld [vmem:[%s2572_s0 + $0x18] sm:$0xff]  ;;  %v1892_v14 = vand.u32 127, %v2581_v13 }
   0x3   :  { %250 = vmatprep.subr.mxu1 %v36_v3  ;;  %v31_v6 = vld [vmem:[%s2572_s0 + $0x10] sm:$0xff]  ;;  %v30_v7 = vld [vmem:[%s2572_s0 + $0x8] sm:$0xff]  ;;  %v1582_v8 = vld [vmem:[%s2573_s1 + $0x20] sm:$0xff] }
   0x4   :  { %251 = vmatpush1.msra.mxu1 %v35_v0  ;;  %v29_v9 = vld [vmem:[%s2572_s0] sm:$0xff]  ;;  %v1583_v10 = vld [vmem:[%s2573_s1 + $0x28] sm:$0xff]  ;;  %v1584_v11 = vld [vmem:[%s2573_s1 + $0x30] sm:$0xff]  ;;  %v39_v15 = vadd.s32 128, %v1892_v14  ;;  %v44_v16 = vand.u32 15, %v1892_v14  ;;  %vm85_vm3 = vcmp.lt.s32.totalorder %v1892_v14, 1 }
   0x5   :  { %252 = vmatprep.subr.mxu1 %v34_v4  ;;  %v1585_v12 = vld [vmem:[%s2573_s1 + $0x38] sm:$0xff]  ;;  %vm331_vm6 = vcmp.lt.s32.totalorder %v1892_v14, 127  ;;  %v108_v46 = vld [vmem:[%s2573_s1] sm:$0xff]  ;;  %v109_v53 = vld [vmem:[%s2573_s1 + $0x8] sm:$0xff] }
   0x6   :  { %83 = vrot.lane.b32.xlu0 %v36_v3, %s1793_s9  ;;  %81 = vrot.lane.b32.xlu1 %v34_v4, %s1793_s9  ;;  %v51_v17 = vand.u32 15, %v39_v15  ;;  %vm94_vm1 = vcmp.ge.s32.totalorder %v44_v16, 1  ;;  %vm340_vm4 = vcmp.lt.s32.totalorder %v44_v16, 15  ;;  %v110_v60 = vld [vmem:[%s2573_s1 + $0x10] sm:$0xff]  ;;  %v1601_v15 = vld [vmem:[%s2573_s1 + $0x58] sm:$0xff] }
   0x7   :  { %253 = vmatpush1.msra.mxu1 %v33_v1  ;;  %v1586_v20 = vsel %vm94_vm1, 1.0, %v2582_v2  ;;  %v1596_v44 = vsel %vm340_vm4, 1.0, %v2582_v2  ;;  %v1600_v14 = vld [vmem:[%s2573_s1 + $0x50] sm:$0xff]  ;;  %v1976_v16 = vld [vmem:[%s2574_s6 + $0xf8] sm:$0xff] }
   0x8   :  { %254 = vmatprep.subr.mxu1 %v32_v5  ;;  %vm95_vm2 = vcmp.ge.s32.totalorder %v51_v17, 1  ;;  %vm341_vm5 = vcmp.lt.s32.totalorder %v51_v17, 15  ;;  %2611 = vst [vmem:[#allocation2_spill] sm:$0xff] %v1976_v16  ;;  %v1982_v17 = vld [vmem:[%s2574_s6 + $0x78] sm:$0xff] }
   0x9   :  { %255 = vmatpush1.msra.mxu1 %v31_v6  ;;  %v1587_v21 = vsel %vm95_vm2, 1.0, %v2582_v2  ;;  %v1597_v45 = vsel %vm341_vm5, 1.0, %v2582_v2 }
   0xa   :  { %79 = vrot.lane.b32.xlu1 %v32_v5, %s1793_s9  ;;  %71 = vrot.lane.b32.xlu0 %v31_v6, %s1793_s9 }
   0xb   :  { %256 = vmatprep.subr.mxu1 %v30_v7 }
   0xc   :  { %257 = vmatpush1.msra.mxu1 %v29_v9 }
   0xd   :  { %1592 = vmatmul.mubr.msk.f32.vlgmr.msra.gmra.mxu1 %vm112_vm0, %v1582_v8  ;;  %1614 = vmatprep.subr.mxu1 %v1976_v16 }
   0xe   :  { %77 = vrot.lane.b32.xlu1 %v30_v7, %s1793_s9  ;;  %69 = vrot.lane.b32.xlu0 %v29_v9, %s1793_s9 }
   0xf   :  { %296 = vmatprep.mubr.f32.mxu1 %v2582_v2  ;;  %1615 = vmatpush3.msra.mxu1 %v1982_v17 }
  0x11   :  { %1593 = vmatmul.mubr.msk.f32.gmra.mxu1 %vm112_vm0, %v1583_v10 }
  0x12   :  { %329 = vrot.lane.b32.xlu1 %v36_v3, %s1794_s26  ;;  %321 = vrot.lane.b32.xlu0 %v35_v0, %s1794_s26 }
  0x13   :  { %302 = vmatprep.mubr.f32.mxu1 %v2582_v2 }
  0x15   :  { %1594 = vmatmul.mubr.msk.f32.gmra.mxu1 %vm112_vm0, %v1584_v11  ;;  %v1598_v11 = vld [vmem:[%s2573_s1 + $0x40] sm:$0xff] }
  0x16   :  { %327 = vrot.lane.b32.xlu1 %v34_v4, %s1794_s26  ;;  %319 = vrot.lane.b32.xlu0 %v33_v1, %s1794_s26  ;;  %v111_v4 = vld [vmem:[%s2573_s1 + $0x18] sm:$0xff] }
  0x17   :  { %308 = vmatprep.mubr.f32.mxu1 %v2582_v2 }
  0x19   :  { %1595 = vmatmul.mubr.msk.f32.gmra.mxu1 %vm112_vm0, %v1585_v12  ;;  %v1599_v12 = vld [vmem:[%s2573_s1 + $0x48] sm:$0xff] }
  0x1a   :  { %325 = vrot.lane.b32.xlu1 %v32_v5, %s1794_s26  ;;  %317 = vrot.lane.b32.xlu0 %v31_v6, %s1794_s26 }
  0x1e   :  { %323 = vrot.lane.b32.xlu1 %v30_v7, %s1794_s26  ;;  %315 = vrot.lane.b32.xlu0 %v29_v9, %s1794_s26 }
  0x74   :  { %v76_v18 = vpop.permute.xlu0 %75  ;;  %v74_v19 = vpop.permute.xlu1 %73 }
  0x78   :  { %v84_v22 = vpop.permute.xlu0 %83  ;;  %v82_v23 = vpop.permute.xlu1 %81 }
  0x79   :  { %v93_v24 = vsel %vm85_vm3, %v84_v22, %v76_v18  ;;  %v88_v25 = vsel %vm85_vm3, %v74_v19, %v82_v23  ;;  %v89_v26 = vsel %vm85_vm3, %v76_v18, %v84_v22  ;;  %v92_v27 = vsel %vm85_vm3, %v82_v23, %v74_v19  ;;  %v1989_v18 = vld [vmem:[%s2574_s6 + $0xf0] sm:$0xff]  ;;  %v2018_v22 = vld [vmem:[%s2574_s6 + $0xe0] sm:$0xff] }
  0x7a   :  { %v107_v28 = vmul.f32 %v1587_v21, %v89_v26  ;;  %v106_v29 = vmul.f32 %v1586_v20, %v93_v24  ;;  %v105_v30 = vmul.f32 %v1587_v21, %v88_v25  ;;  %v104_v33 = vmul.f32 %v1586_v20, %v92_v27  ;;  %1616 = vmatprep.subr.mxu1 %v1989_v18  ;;  %v1996_v19 = vld [vmem:[%s2574_s6 + $0x70] sm:$0xff]  ;;  %v2024_v23 = vld [vmem:[%s2574_s6 + $0x60] sm:$0xff]  ;;  %v2031_v24 = vld [vmem:[%s2574_s6 + $0xd8] sm:$0xff] }
  0x7b   :  { %1617 = vmatpush3.msra.mxu1 %v1996_v19  ;;  %v2038_v25 = vld [vmem:[%s2574_s6 + $0x58] sm:$0xff]  ;;  %v2045_v26 = vld [vmem:[%s2574_s6 + $0xd0] sm:$0xff] }
  0x7c   :  { %149 = vmatprep.subr.mxu0 %v107_v28  ;;  %v80_v31 = vpop.permute.xlu1 %79  ;;  %v72_v32 = vpop.permute.xlu0 %71  ;;  %v2052_v27 = vld [vmem:[%s2574_s6 + $0x50] sm:$0xff]  ;;  %v2059_v28 = vld [vmem:[%s2574_s6 + $0xc8] sm:$0xff] }
  0x7d   :  { %v87_v34 = vsel %vm85_vm3, %v72_v32, %v80_v31  ;;  %v91_v35 = vsel %vm85_vm3, %v80_v31, %v72_v32  ;;  %150 = vmatpush1.msra.mxu0 %v106_v29  ;;  %v2066_v29 = vld [vmem:[%s2574_s6 + $0x48] sm:$0xff]  ;;  %v2080_v31 = vld [vmem:[%s2574_s6 + $0x40] sm:$0xff]  ;;  %v2087_v32 = vld [vmem:[%s2574_s6 + $0xb8] sm:$0xff] }
  0x7e   :  { %v102_v36 = vmul.f32 %v1586_v20, %v91_v35  ;;  %v103_v37 = vmul.f32 %v1587_v21, %v87_v34  ;;  %151 = vmatprep.subr.mxu0 %v105_v30  ;;  %v2073_v30 = vld [vmem:[%s2574_s6 + $0xc0] sm:$0xff]  ;;  %v2101_v34 = vld [vmem:[%s2574_s6 + $0xb0] sm:$0xff] }
  0x7f   :  { %152 = vmatpush1.msra.mxu0 %v104_v33  ;;  %v2094_v33 = vld [vmem:[%s2574_s6 + $0x38] sm:$0xff]  ;;  %v2108_v35 = vld [vmem:[%s2574_s6 + $0x30] sm:$0xff] }
  0x80   :  { %153 = vmatprep.subr.mxu0 %v103_v37  ;;  %v78_v38 = vpop.permute.xlu1 %77  ;;  %v70_v39 = vpop.permute.xlu0 %69  ;;  %v2122_v37 = vld [vmem:[%s2574_s6 + $0x28] sm:$0xff] }
  0x81   :  { %v86_v40 = vsel %vm85_vm3, %v70_v39, %v78_v38  ;;  %v90_v41 = vsel %vm85_vm3, %v78_v38, %v70_v39  ;;  %154 = vmatpush1.msra.mxu0 %v102_v36  ;;  %v2115_v36 = vld [vmem:[%s2574_s6 + $0xa8] sm:$0xff]  ;;  %v2129_v38 = vld [vmem:[%s2574_s6 + $0xa0] sm:$0xff] }
  0x82   :  { %v100_v42 = vmul.f32 %v1586_v20, %v90_v41  ;;  %v101_v43 = vmul.f32 %v1587_v21, %v86_v40  ;;  %v2003_v20 = vld [vmem:[%s2574_s6 + $0xe8] sm:$0xff]  ;;  %v2136_v39 = vld [vmem:[%s2574_s6 + $0x20] sm:$0xff]  ;;  %v2143_v40 = vld [vmem:[%s2574_s6 + $0x98] sm:$0xff] }
  0x83   :  { %1618 = vmatprep.subr.mxu1 %v2003_v20  ;;  %v2010_v21 = vld [vmem:[%s2574_s6 + $0x68] sm:$0xff]  ;;  %v2148_v41 = vld [vmem:[%s2574_s6 + $0x18] sm:$0xff] }
  0x84   :  { %v330_v47 = vpop.permute.xlu1 %329  ;;  %155 = vmatprep.subr.mxu0 %v101_v43  ;;  %v322_v48 = vpop.permute.xlu0 %321  ;;  %1619 = vmatpush3.msra.mxu1 %v2010_v21  ;;  %2612 = vst [vmem:[#allocation3_spill] sm:$0xff] %v2148_v41  ;;  %v2161_v43 = vld [vmem:[%s2574_s6 + $0x10] sm:$0xff] }
  0x85   :  { %v335_v49 = vsel %vm331_vm6, %v322_v48, %v330_v47  ;;  %v339_v50 = vsel %vm331_vm6, %v330_v47, %v322_v48  ;;  %156 = vmatpush1.msra.mxu0 %v100_v42  ;;  %1620 = vmatprep.subr.mxu1 %v2018_v22  ;;  %v2154_v42 = vld [vmem:[%s2574_s6 + $0x90] sm:$0xff]  ;;  %2614 = vst [vmem:[#allocation5_spill] sm:$0xff] %v2161_v43  ;;  %v2189_v47 = vld [vmem:[%s2574_s6] sm:$0xff] }
  0x86   :  { %v352_v51 = vmul.f32 %v1596_v44, %v335_v49  ;;  %v353_v52 = vmul.f32 %v1597_v45, %v339_v50  ;;  %1588 = vmatmul.mubr.msk.f32.vlgmr.msra.gmra.mxu0 %vm112_vm0, %v108_v46  ;;  %1621 = vmatpush3.msra.mxu1 %v2024_v23  ;;  %2613 = vst [vmem:[#allocation4_spill] sm:$0xff] %v2154_v42  ;;  %v2182_v46 = vld [vmem:[%s2574_s6 + $0x80] sm:$0xff]  ;;  %2618 = vst [vmem:[#allocation9_spill] sm:$0xff] %v2189_v47 }
  0x87   :  { %195 = vmatprep.mubr.f32.mxu0 %v2582_v2  ;;  %1622 = vmatprep.subr.mxu1 %v2031_v24  ;;  %2617 = vst [vmem:[#allocation8_spill] sm:$0xff] %v2182_v46 }
  0x88   :  { %v328_v54 = vpop.permute.xlu1 %327  ;;  %395 = vmatprep.subr.mxu0 %v353_v52  ;;  %v320_v55 = vpop.permute.xlu0 %319  ;;  %1623 = vmatpush3.msra.mxu1 %v2038_v25 }
  0x89   :  { %v334_v56 = vsel %vm331_vm6, %v320_v55, %v328_v54  ;;  %v338_v57 = vsel %vm331_vm6, %v328_v54, %v320_v55  ;;  %396 = vmatpush1.msra.mxu0 %v352_v51  ;;  %1624 = vmatprep.subr.mxu1 %v2045_v26 }
  0x8a   :  { %v350_v58 = vmul.f32 %v1596_v44, %v334_v56  ;;  %v351_v59 = vmul.f32 %v1597_v45, %v338_v57  ;;  %1589 = vmatmul.mubr.msk.f32.gmra.mxu0 %vm112_vm0, %v109_v53  ;;  %1625 = vmatpush3.msra.mxu1 %v2052_v27 }
  0x8b   :  { %201 = vmatprep.mubr.f32.mxu0 %v2582_v2  ;;  %1626 = vmatprep.subr.mxu1 %v2059_v28 }
  0x8c   :  { %v326_v61 = vpop.permute.xlu1 %325  ;;  %397 = vmatprep.subr.mxu0 %v351_v59  ;;  %v318_v62 = vpop.permute.xlu0 %317  ;;  %1627 = vmatpush3.msra.mxu1 %v2066_v29 }
  0x8d   :  { %v333_v63 = vsel %vm331_vm6, %v318_v62, %v326_v61  ;;  %v337_v0 = vsel %vm331_vm6, %v326_v61, %v318_v62  ;;  %398 = vmatpush1.msra.mxu0 %v350_v58  ;;  %1628 = vmatprep.subr.mxu1 %v2073_v30 }
  0x8e   :  { %v348_v1 = vmul.f32 %v1596_v44, %v333_v63  ;;  %v349_v3 = vmul.f32 %v1597_v45, %v337_v0  ;;  %1590 = vmatmul.mubr.msk.f32.gmra.mxu0 %vm112_vm0, %v110_v60  ;;  %1629 = vmatpush3.msra.mxu1 %v2080_v31 }
  0x8f   :  { %207 = vmatprep.mubr.f32.mxu0 %v2582_v2  ;;  %1630 = vmatprep.subr.mxu1 %v2087_v32 }
  0x90   :  { %v324_v5 = vpop.permute.xlu1 %323  ;;  %399 = vmatprep.subr.mxu0 %v349_v3  ;;  %v316_v6 = vpop.permute.xlu0 %315  ;;  %1631 = vmatpush3.msra.mxu1 %v2094_v33 }
  0x91   :  { %v332_v7 = vsel %vm331_vm6, %v316_v6, %v324_v5  ;;  %v336_v8 = vsel %vm331_vm6, %v324_v5, %v316_v6  ;;  %400 = vmatpush1.msra.mxu0 %v348_v1  ;;  %1632 = vmatprep.subr.mxu1 %v2101_v34  ;;  %v468_v5 = vld [vmem:[%s2575_s4] sm:$0xff] }
  0x92   :  { %v346_v9 = vmul.f32 %v1596_v44, %v332_v7  ;;  %v347_v10 = vmul.f32 %v1597_v45, %v336_v8  ;;  %1591 = vmatmul.mubr.msk.f32.gmra.mxu0 %vm112_vm0, %v111_v4  ;;  %1633 = vmatpush3.msra.mxu1 %v2108_v35  ;;  %v2168_v44 = vld [vmem:[%s2574_s6 + $0x88] sm:$0xff]  ;;  %v470_v7 = vld [vmem:[%s2575_s4 + $0x10] sm:$0xff] }
  0x93   :  { %435 = vmatprep.mubr.f32.mxu0 %v2582_v2  ;;  %1634 = vmatprep.subr.mxu1 %v2115_v36  ;;  %2615 = vst [vmem:[#allocation6_spill] sm:$0xff] %v2168_v44  ;;  %v2175_v45 = vld [vmem:[%s2574_s6 + $0x8] sm:$0xff] }
  0x94   :  { %401 = vmatprep.subr.mxu0 %v347_v10  ;;  %1635 = vmatpush3.msra.mxu1 %v2122_v37  ;;  %2616 = vst [vmem:[#allocation7_spill] sm:$0xff] %v2175_v45 }
  0x95   :  { %402 = vmatpush1.msra.mxu0 %v346_v9  ;;  %1636 = vmatprep.subr.mxu1 %v2129_v38 }
  0x96   :  { %1602 = vmatmul.mubr.msk.f32.vlgmr.msra.gmra.mxu0 %vm112_vm0, %v1598_v11  ;;  %1649 = vmatprep.subr.mxu0 %v1976_v16 }
  0x97   :  { %441 = vmatprep.mubr.f32.mxu0 %v2582_v2  ;;  %1650 = vmatpush3.msra.mxu0 %v1982_v17 }
  0x98   :  { %1651 = vmatprep.subr.mxu0 %v1989_v18  ;;  %1637 = vmatpush3.msra.mxu1 %v2136_v39 }
  0x99   :  { %1652 = vmatpush3.msra.mxu0 %v1996_v19  ;;  %1638 = vmatprep.subr.mxu1 %v2143_v40 }
  0x9a   :  { %1603 = vmatmul.mubr.msk.f32.gmra.mxu0 %vm112_vm0, %v1599_v12  ;;  %1653 = vmatprep.subr.mxu0 %v2003_v20  ;;  %v469_v12 = vld [vmem:[%s2575_s4 + $0x8] sm:$0xff] }
  0x9b   :  { %447 = vmatprep.mubr.f32.mxu0 %v2582_v2  ;;  %1654 = vmatpush3.msra.mxu0 %v2010_v21 }
  0x9c   :  { %1655 = vmatprep.subr.mxu0 %v2018_v22  ;;  %1639 = vmatpush3.msra.mxu1 %v2148_v41 }
  0x9d   :  { %1656 = vmatpush3.msra.mxu0 %v2024_v23  ;;  %1640 = vmatprep.subr.mxu1 %v2154_v42 }
  0x9e   :  { %1604 = vmatmul.mubr.msk.f32.gmra.mxu0 %vm112_vm0, %v1600_v14  ;;  %1657 = vmatprep.subr.mxu0 %v2031_v24 }
  0x9f   :  { %453 = vmatprep.mubr.f32.mxu0 %v2582_v2  ;;  %1658 = vmatpush3.msra.mxu0 %v2038_v25 }
  0xa0   :  { %1659 = vmatprep.subr.mxu0 %v2045_v26  ;;  %1641 = vmatpush3.msra.mxu1 %v2161_v43 }
  0xa1   :  { %1660 = vmatpush3.msra.mxu0 %v2052_v27  ;;  %1642 = vmatprep.subr.mxu1 %v2168_v44 }
  0xa2   :  { %1605 = vmatmul.mubr.msk.f32.gmra.mxu0 %vm112_vm0, %v1601_v15  ;;  %1661 = vmatprep.subr.mxu0 %v2059_v28  ;;  %v471_v15 = vld [vmem:[%s2575_s4 + $0x18] sm:$0xff] }
  0xa3   :  { %1662 = vmatpush3.msra.mxu0 %v2066_v29  ;;  %1643 = vmatpush3.msra.mxu1 %v2175_v45 }
  0xa4   :  { %1663 = vmatprep.subr.mxu0 %v2073_v30  ;;  %1644 = vmatprep.subr.mxu1 %v2182_v46 }
  0xa5   :  { %1664 = vmatpush3.msra.mxu0 %v2080_v31  ;;  %1645 = vmatpush3.msra.mxu1 %v2189_v47 }
  0xa6   :  { %1665 = vmatprep.subr.mxu0 %v2087_v32 }
  0xa7   :  { %1666 = vmatpush3.msra.mxu0 %v2094_v33 }
  0xa8   :  { %1667 = vmatprep.subr.mxu0 %v2101_v34 }
  0xa9   :  { %1668 = vmatpush3.msra.mxu0 %v2108_v35 }
  0xaa   :  { %1669 = vmatprep.subr.mxu0 %v2115_v36 }
  0xab   :  { %1670 = vmatpush3.msra.mxu0 %v2122_v37 }
  0xac   :  { %1671 = vmatprep.subr.mxu0 %v2129_v38 }
  0xad   :  { %1672 = vmatpush3.msra.mxu0 %v2136_v39 }
  0xae   :  { %1673 = vmatprep.subr.mxu0 %v2143_v40 }
  0xaf   :  { %1674 = vmatpush3.msra.mxu0 %v2148_v41 }
  0xb0   :  { %1675 = vmatprep.subr.mxu0 %v2154_v42 }
  0xb1   :  { %1676 = vmatpush3.msra.mxu0 %v2161_v43 }
  0xb2   :  { %1677 = vmatprep.subr.mxu0 %v2168_v44 }
  0xb3   :  { %1678 = vmatpush3.msra.mxu0 %v2175_v45 }
  0xb4   :  { %1679 = vmatprep.subr.mxu0 %v2182_v46 }
  0xb5   :  { %1680 = vmatpush3.msra.mxu0 %v2189_v47 }
  0xb6   :  { %1684 = vmatprep.subr.mxu0 %v1976_v16 }
  0xcd   :  { %v292_v48 = vpop.f32.mrf.mxu1 }
  0xcf   :  { %v294_v51 = vpop.f32.mrf.mxu1 }
  0xd1   :  { %v298_v53 = vpop.f32.mrf.mxu1 }
  0xd3   :  { %v300_v56 = vpop.f32.mrf.mxu1 }
  0xd5   :  { %v304_v59 = vpop.f32.mrf.mxu1 }
  0xd7   :  { %v306_v63 = vpop.f32.mrf.mxu1 }
  0xd9   :  { %v310_v11 = vpop.f32.mrf.mxu1 }
 0x146   :  { %v191_v49 = vpop.f32.mrf.mxu0 }
 0x147   :  { %v293_v62 = vadd.f32 %v292_v48, %v191_v49 }
 0x148   :  { %v193_v50 = vpop.f32.mrf.mxu0 }
 0x149   :  { %v295_v1 = vadd.f32 %v294_v51, %v193_v50  ;;  %v486_v51 = vld [vmem:[%s2576_s5 + $0x10] sm:$0xff] }
 0x14a   :  { %v197_v52 = vpop.f32.mrf.mxu0 }
 0x14b   :  { %v299_v3 = vadd.f32 %v298_v53, %v197_v52  ;;  %v484_v53 = vld [vmem:[%s2576_s5] sm:$0xff] }
 0x14c   :  { %v199_v54 = vpop.f32.mrf.mxu0 }
 0x14d   :  { %v301_v8 = vadd.f32 %v300_v56, %v199_v54  ;;  %v487_v54 = vld [vmem:[%s2576_s5 + $0x18] sm:$0xff] }
 0x14e   :  { %v203_v55 = vpop.f32.mrf.mxu0 }
 0x14f   :  { %v305_v48 = vadd.f32 %v304_v59, %v203_v55  ;;  %v472_v55 = vld [vmem:[%s2575_s4 + $0x20] sm:$0xff] }
 0x150   :  { %v205_v57 = vpop.f32.mrf.mxu0 }
 0x152   :  { %v209_v58 = vpop.f32.mrf.mxu0 }
 0x154   :  { %v211_v60 = vpop.f32.mrf.mxu0 }
 0x156   :  { %v437_v61 = vpop.f32.mrf.mxu0 }
 0x157   :  { %v460_v4 = vadd.f32 %v437_v61, %v293_v62 }
 0x158   :  { %v439_v0 = vpop.f32.mrf.mxu0 }
 0x159   :  { %v461_v9 = vadd.f32 %v439_v0, %v295_v1  ;;  %v476_v49 = vmul.f32 %v468_v5, %v460_v4  ;;  %v307_v0 = vadd.f32 %v306_v63, %v205_v57  ;;  %v312_v1 = vpop.f32.mrf.mxu1  ;;  %v488_v5 = vld [vmem:[%s2576_s5 + $0x20] sm:$0xff]  ;;  %v473_v57 = vld [vmem:[%s2575_s4 + $0x28] sm:$0xff]  ;;  %v311_v63 = vadd.f32 %v310_v11, %v209_v58 }
 0x15a   :  { %v443_v6 = vpop.f32.mrf.mxu0 }
 0x15b   :  { %v462_v10 = vadd.f32 %v443_v6, %v299_v3  ;;  %v477_v59 = vmul.f32 %v469_v12, %v461_v9  ;;  %v485_v3 = vld [vmem:[%s2576_s5 + $0x8] sm:$0xff] }
 0x15c   :  { %v445_v14 = vpop.f32.mrf.mxu0 }
 0x15d   :  { %v478_v50 = vmul.f32 %v470_v7, %v462_v10  ;;  %v463_v52 = vadd.f32 %v445_v14, %v301_v8  ;;  %v2230_v7 = vadd.f32 %v484_v53, %v476_v49  ;;  %v313_v14 = vadd.f32 %v312_v1, %v211_v60  ;;  %v489_v49 = vld [vmem:[%s2576_s5 + $0x28] sm:$0xff]  ;;  %v475_v60 = vld [vmem:[%s2575_s4 + $0x38] sm:$0xff] }
 0x15e   :  { %v449_v56 = vpop.f32.mrf.mxu0  ;;  %v491_v1 = vld [vmem:[%s2576_s5 + $0x38] sm:$0xff] }
 0x15f   :  { %v479_v61 = vmul.f32 %v471_v15, %v463_v52  ;;  %v464_v62 = vadd.f32 %v449_v56, %v305_v48  ;;  %v2225_v4 = vadd.f32 %v486_v51, %v478_v50  ;;  %v2237_v15 = vadd.f32 %v485_v3, %v477_v59  ;;  %v474_v50 = vld [vmem:[%s2575_s4 + $0x30] sm:$0xff] }
 0x160   :  { %v451_v6 = vpop.f32.mrf.mxu0  ;;  %v522_v53 = vmul.f32 %v2230_v7, %v2230_v7  ;;  %v490_v56 = vld [vmem:[%s2576_s5 + $0x30] sm:$0xff] }
 0x161   :  { %v2232_v8 = vadd.f32 %v487_v54, %v479_v61  ;;  %v480_v9 = vmul.f32 %v472_v55, %v464_v62  ;;  %v465_v10 = vadd.f32 %v451_v6, %v307_v0  ;;  %2620 = vst [vmem:[#allocation11_spill] sm:$0xff] %v2237_v15  ;;  %v524_v51 = vmul.f32 %v2225_v4, %v2225_v4 }
 0x162   :  { %v455_v12 = vpop.f32.mrf.mxu0  ;;  %v504_v59 = vadd.f32 %v2225_v4, %v2230_v7  ;;  %v523_v3 = vmul.f32 %v2237_v15, %v2237_v15 }
 0x163   :  { %2619 = vst [vmem:[#allocation10_spill] sm:$0xff] %v2232_v8  ;;  %v2239_v48 = vadd.f32 %v488_v5, %v480_v9  ;;  %v481_v52 = vmul.f32 %v473_v57, %v465_v10  ;;  %v466_v58 = vadd.f32 %v455_v12, %v311_v63  ;;  %v525_v54 = vmul.f32 %v2232_v8, %v2232_v8 }
 0x164   :  { %v457_v11 = vpop.f32.mrf.mxu0  ;;  %v513_v5 = vadd.f32 %v2232_v8, %v2237_v15  ;;  %v530_v9 = vadd.f32 %v524_v51, %v522_v53 }
 0x165   :  { %v467_v55 = vadd.f32 %v457_v11, %v313_v14  ;;  %v526_v61 = vmul.f32 %v2239_v48, %v2239_v48  ;;  %v2263_v62 = vadd.f32 %v489_v49, %v481_v52  ;;  %v482_v0 = vmul.f32 %v474_v50, %v466_v58 }
 0x166   :  { %v505_v57 = vadd.f32 %v504_v59, %v2239_v48  ;;  %v539_v12 = vadd.f32 %v525_v54, %v523_v3 }
 0x167   :  { %v483_v6 = vmul.f32 %v475_v60, %v467_v55  ;;  %v527_v63 = vmul.f32 %v2263_v62, %v2263_v62  ;;  %v2275_v10 = vadd.f32 %v490_v56, %v482_v0  ;;  %v514_v14 = vadd.f32 %v513_v5, %v2263_v62 }
 0x168   :  { %v531_v50 = vadd.f32 %v530_v9, %v526_v61 }
 0x169   :  { %v2278_v49 = vadd.f32 %v491_v1, %v483_v6  ;;  %v506_v52 = vadd.f32 %v505_v57, %v2275_v10  ;;  %v528_v58 = vmul.f32 %v2275_v10, %v2275_v10  ;;  %v540_v11 = vadd.f32 %v539_v12, %v527_v63 }
 0x16b   :  { %v515_v51 = vadd.f32 %v514_v14, %v2278_v49  ;;  %v529_v60 = vmul.f32 %v2278_v49, %v2278_v49  ;;  %v507_v53 = vrot.slane %v506_v52, 4  ;;  %v532_v56 = vadd.f32 %v531_v50, %v528_v58 }
 0x16d   :  { %v516_v55 = vrot.slane %v515_v51, 4  ;;  %v541_v54 = vadd.f32 %v540_v11, %v529_v60  ;;  %v508_v59 = vadd.f32 %v507_v53, %v506_v52  ;;  %v533_v0 = vrot.slane %v532_v56, 4  ;;  %v2347_v53 = vld [vmem:[%s2578_s3 + $0x10] sm:$0xff] }
 0x16e   :  { %v2621_v60 = vmov 0.0   ;;  %2626 = vst [vmem:[#allocation16_spill] sm:$0xff] %v2347_v53 }
 0x16f   :  { %v517_v1 = vadd.f32 %v516_v55, %v515_v51  ;;  %v542_v3 = vrot.slane %v541_v54, 4  ;;  %v509_v61 = vrot.slane %v508_v59, 2  ;;  %v534_v5 = vadd.f32 %v533_v0, %v532_v56  ;;  %v2352_v56 = vld [vmem:[%s2578_s3 + $0x18] sm:$0xff]  ;;  %v2359_v55 = vld [vmem:[%s2578_s3 + $0x8] sm:$0xff]  ;;  %v2368_v0 = vld [vmem:[%s2578_s3] sm:$0xff] }
 0x170   :  { %2627 = vst [vmem:[#allocation17_spill] sm:$0xff] %v2352_v56  ;;  %2628 = vst [vmem:[#allocation18_spill] sm:$0xff] %v2359_v55 }
 0x171   :  { %v518_v6 = vrot.slane %v517_v1, 2  ;;  %v543_v9 = vadd.f32 %v542_v3, %v541_v54  ;;  %v510_v57 = vadd.f32 %v509_v61, %v508_v59  ;;  %v535_v13 = vrot.slane %v534_v5, 2  ;;  %2629 = vst [vmem:[#allocation19_spill] sm:$0xff] %v2368_v0 }
 0x172   :  { %v1796_v54 = vmov 1   ;;  %v1797_v59 = vmov 2  }
 0x173   :  { %v519_v63 = vadd.f32 %v518_v6, %v517_v1  ;;  %v544_v12 = vrot.slane %v543_v9, 2  ;;  %v511_v14 = vrot.slane %v510_v57, 1  ;;  %v536_v2 = vadd.f32 %v535_v13, %v534_v5  ;;  %v2327_v13 = vld [vmem:[%s2577_s7 + $0x10] sm:$0xff] }
 0x174   :  { %2623 = vst [vmem:[#allocation13_spill] sm:$0xff] %v2327_v13 }
 0x175   :  { %v520_v16 = vrot.slane %v519_v63, 1  ;;  %v545_v8 = vadd.f32 %v544_v12, %v543_v9  ;;  %v537_v15 = vrot.slane %v536_v2, 1  ;;  %v512_v11 = vadd.f32 %v511_v14, %v510_v57 }
 0x176   :  { %v1798_v12 = vmov 3  }
 0x177   :  { %v521_v50 = vadd.f32 %v520_v16, %v519_v63  ;;  %v546_v58 = vrot.slane %v545_v8, 1  ;;  %v538_v51 = vadd.f32 %v537_v15, %v536_v2  ;;  %v2321_v2 = vld [vmem:[%s2577_s7 + $0x18] sm:$0xff]  ;;  %v2334_v16 = vld [vmem:[%s2577_s7 + $0x8] sm:$0xff]  ;;  %v1795_v15 = vmov 0  }
 0x178   :  { %2622 = vst [vmem:[#allocation12_spill] sm:$0xff] %v2321_v2  ;;  %758 = vmatprep.subr.mxu1 %v2321_v2  ;;  %2624 = vst [vmem:[#allocation14_spill] sm:$0xff] %v2334_v16  ;;  %1764 = vset.pattern.permute.xlu1 %v1795_v15 }
 0x179   :  { %644 = vmatprep.mubr.f32.mxu1 %v521_v50  ;;  %v547_v52 = vadd.f32 %v546_v58, %v545_v8  ;;  %v2340_v8 = vld [vmem:[%s2577_s7] sm:$0xff]  ;;  %1763 = vset.pattern.permute.xlu0 %v1795_v15 }
 0x17a   :  { %645 = vmatmul.mubr.f32.vlgmr.msra.gmra.mxu1 %v512_v11  ;;  %2625 = vst [vmem:[#allocation15_spill] sm:$0xff] %v2340_v8  ;;  %929 = vperm.xlu1 %1764, %v2347_v53  }
 0x17b   :  { %715 = vmatprep.mubr.f32.mxu0 %v547_v52  ;;  %794 = vmatprep.mubr.f32.mxu1 %v2621_v60 }
 0x17c   :  { %716 = vmatmul.mubr.f32.vlgmr.msra.gmra.mxu0 %v538_v51  ;;  %759 = vmatpush1.msra.mxu1 %v2327_v13 }
 0x17d   :  { %1685 = vmatpush3.msra.mxu0 %v1982_v17  ;;  %760 = vmatprep.subr.mxu1 %v2334_v16 }
 0x17e   :  { %1686 = vmatprep.subr.mxu0 %v1989_v18  ;;  %761 = vmatpush1.msra.mxu1 %v2340_v8 }
 0x17f   :  { %1687 = vmatpush3.msra.mxu0 %v1996_v19  ;;  %832 = vmatprep.subr.mxu1 %v2321_v2 }
 0x180   :  { %1688 = vmatprep.subr.mxu0 %v2003_v20  ;;  %934 = vperm.xlu0 %1763, %v2352_v56  }
 0x181   :  { %1689 = vmatpush3.msra.mxu0 %v2010_v21  ;;  %1765 = vset.pattern.permute.xlu1 %v1796_v54 }
 0x182   :  { %1690 = vmatprep.subr.mxu0 %v2018_v22  ;;  %958 = vperm.xlu1 %1765, %v2352_v56  }
 0x183   :  { %1691 = vmatpush3.msra.mxu0 %v2024_v23 }
 0x184   :  { %1692 = vmatprep.subr.mxu0 %v2031_v24  ;;  %924 = vperm.xlu0 %1763, %v2359_v55  }
 0x185   :  { %1693 = vmatpush3.msra.mxu0 %v2038_v25 }
 0x186   :  { %1694 = vmatprep.subr.mxu0 %v2045_v26  ;;  %954 = vperm.xlu1 %1765, %v2347_v53  }
 0x187   :  { %1695 = vmatpush3.msra.mxu0 %v2052_v27 }
 0x188   :  { %1696 = vmatprep.subr.mxu0 %v2059_v28  ;;  %1766 = vset.pattern.permute.xlu0 %v1797_v59 }
 0x189   :  { %1697 = vmatpush3.msra.mxu0 %v2066_v29  ;;  %990 = vperm.xlu0 %1766, %v2352_v56  }
 0x18a   :  { %1698 = vmatprep.subr.mxu0 %v2073_v30  ;;  %1767 = vset.pattern.permute.xlu1 %v1795_v15 }
 0x18b   :  { %1699 = vmatpush3.msra.mxu0 %v2080_v31  ;;  %919 = vperm.xlu1 %1767, %v2368_v0  }
 0x18c   :  { %1700 = vmatprep.subr.mxu0 %v2087_v32 }
 0x18d   :  { %1701 = vmatpush3.msra.mxu0 %v2094_v33  ;;  %986 = vperm.xlu0 %1766, %v2347_v53  }
 0x18e   :  { %1702 = vmatprep.subr.mxu0 %v2101_v34 }
 0x18f   :  { %1703 = vmatpush3.msra.mxu0 %v2108_v35  ;;  %1768 = vset.pattern.permute.xlu1 %v1796_v54 }
 0x190   :  { %1704 = vmatprep.subr.mxu0 %v2115_v36  ;;  %950 = vperm.xlu1 %1768, %v2359_v55  }
 0x191   :  { %1705 = vmatpush3.msra.mxu0 %v2122_v37  ;;  %982 = vperm.xlu0 %1766, %v2359_v55  }
 0x192   :  { %1706 = vmatprep.subr.mxu0 %v2129_v38 }
 0x193   :  { %1707 = vmatpush3.msra.mxu0 %v2136_v39 }
 0x194   :  { %1708 = vmatprep.subr.mxu0 %v2143_v40  ;;  %946 = vperm.xlu1 %1768, %v2368_v0  }
 0x195   :  { %1709 = vmatpush3.msra.mxu0 %v2148_v41  ;;  %1770 = vset.pattern.permute.xlu0 %v1798_v12 }
 0x196   :  { %1710 = vmatprep.subr.mxu0 %v2154_v42  ;;  %1014 = vperm.xlu0 %1770, %v2368_v0  }
 0x197   :  { %1711 = vmatpush3.msra.mxu0 %v2161_v43 }
 0x198   :  { %1712 = vmatprep.subr.mxu0 %v2168_v44  ;;  %1769 = vset.pattern.permute.xlu1 %v1797_v59 }
 0x199   :  { %1713 = vmatpush3.msra.mxu0 %v2175_v45  ;;  %978 = vperm.xlu1 %1769, %v2368_v0  }
 0x19a   :  { %1714 = vmatprep.subr.mxu0 %v2182_v46  ;;  %1026 = vperm.xlu0 %1770, %v2352_v56  }
 0x19b   :  { %1715 = vmatpush3.msra.mxu0 %v2189_v47 }
 0x19c   :  { %1347 = vmatprep.subr.mxu0 %v2321_v2 }
 0x19d   :  { %1771 = vset.pattern.permute.xlu1 %v1798_v12 }
 0x19e   :  { %1018 = vperm.xlu1 %1771, %v2359_v55  }
 0x1a2   :  { %1022 = vperm.xlu1 %1771, %v2347_v53  }
 0x1f5   :  { %v930_v50 = vpop.permute.xlu1 %929 }
 0x23a   :  { %v1646_v1 = vpop.f32.mrf.mxu1 }
 0x23c   :  { %v1647_v3 = vpop.f32.mrf.mxu1  ;;  %v1681_v61 = vpop.f32.mrf.mxu0 }
 0x23d   :  { %v1648_v5 = vadd.f32 %v1647_v3, %v1646_v1  ;;  %v959_v3 = vpop.permute.xlu1 %958 }
 0x23e   :  { %v1682_v6 = vpop.f32.mrf.mxu0 }
 0x23f   :  { %v650_v9 = vmul.f32 0.001953125, %v1648_v5  ;;  %v1683_v57 = vadd.f32 %v1682_v6, %v1681_v61 }
 0x241   :  { %1606 = vmatmul.mubr.msk.f32.vlgmr.msra.gmra.mxu1 %vm726_vm7, %v650_v9  ;;  %v721_v63 = vmul.f32 0.001953125, %v1683_v57  ;;  %v935_v9 = vpop.permute.xlu0 %934  ;;  %v2630_v57 = vlaneseq  ;;  %v955_v12 = vpop.permute.xlu1 %954 }
 0x242   :  { %833 = vmatpush1.msra.mxu1 %v2327_v13  ;;  %868 = vmatprep.mubr.f32.mxu1 %v2621_v60 }
 0x243   :  { %834 = vmatprep.subr.mxu1 %v2334_v16  ;;  %v2632_v16 = vld [vmem:[#allocation11_spill] sm:$0xff] }
 0x244   :  { %835 = vmatpush1.msra.mxu1 %v2340_v8 }
 0x245   :  { %1607 = vmatmul.mubr.msk.f32.vlgmr.msra.gmra.mxu1 %vm726_vm7, %v721_v63  ;;  %v882_v63 = vshrl.u32 %v2630_v57, 7  ;;  %v925_v53 = vpop.permute.xlu0 %924  ;;  %v920_v55 = vpop.permute.xlu1 %919 }
 0x246   :  { %1105 = vmatprep.mubr.f32.mxu1 %v2621_v60 }
 0x247   :  { %v2388_v56 = vsub.s32 0, %v882_v63 }
 0x249   :  { %2631 = vst [vmem:[#allocation20_spill] sm:$0xff] %v2388_v56 }
 0x301   :  { %v796_v14 = vpop.f32.mrf.mxu1 }
 0x302   :  { %v875_v11 = vmul.f32 %v796_v14, %v796_v14  ;;  %v884_v0 = vrot.slane %v796_v14, %v2388_v56 }
 0x303   :  { %v798_v58 = vpop.f32.mrf.mxu1 }
 0x304   :  { %v876_v51 = vmul.f32 %v798_v58, %v798_v58  ;;  %v891_v57 = vsub.f32 %v2225_v4, %v884_v0 }
 0x305   :  { %v870_v52 = vpop.f32.mrf.mxu1 }
 0x306   :  { %v877_v15 = vsub.f32 %v870_v52, %v875_v11  ;;  %v888_v11 = vrot.slane %v798_v58, %v2388_v56 }
 0x307   :  { %v872_v54 = vpop.f32.mrf.mxu1 }
 0x308   :  { %v879_v59 = vmax.f32 %v877_v15, 0.0  ;;  %v878_v1 = vsub.f32 %v872_v54, %v876_v51  ;;  %v991_v51 = vpop.permute.xlu0 %990  ;;  %v893_v15 = vsub.f32 %v2239_v48, %v884_v0  ;;  %v896_v58 = vsub.f32 %v2278_v49, %v888_v11 }
 0x309   :  { %v890_v48 = vsub.f32 %v2632_v16, %v888_v11 }
 0x30a   :  { %v897_v61 = vadd.f32 1e-05, %v879_v59  ;;  %v880_v5 = vmax.f32 %v878_v1, 0.0  ;;  %v895_v59 = vsub.f32 %v2275_v10, %v884_v0  ;;  %v951_v1 = vpop.permute.xlu1 %950 }
 0x30c   :  { %1776 = vrsqrt.f32 %v897_v61  ;;  %v898_v6 = vadd.f32 1e-05, %v880_v5  ;;  %v894_v5 = vsub.f32 %v2263_v62, %v888_v11  ;;  %v987_v4 = vpop.permute.xlu0 %986 }
 0x30e   :  { %1778 = vrsqrt.f32 %v898_v6  ;;  %v889_v6 = vsub.f32 %v2230_v7, %v884_v0 }
 0x319   :  { %v1777_v52 = vpop.eup %1776 }
 0x31a   :  { %v904_v54 = vrot.slane %v1777_v52, %v2388_v56  ;;  %v2633_v52 = vld [vmem:[#allocation10_spill] sm:$0xff] }
 0x31b   :  { %v1779_v61 = vpop.eup %1778  ;;  %v892_v2 = vsub.f32 %v2633_v52, %v888_v11 }
 0x31c   :  { %v908_v14 = vrot.slane %v1779_v61, %v2388_v56  ;;  %v913_v63 = vmul.f32 %v904_v54, %v893_v15  ;;  %v915_v8 = vmul.f32 %v904_v54, %v895_v59  ;;  %v909_v13 = vmul.f32 %v904_v54, %v889_v6  ;;  %v947_v56 = vpop.permute.xlu1 %946 }
 0x31d   :  { %v911_v10 = vmul.f32 %v904_v54, %v891_v57 }
 0x31e   :  { %v914_v47 = vmul.f32 %v908_v14, %v894_v5  ;;  %v941_v46 = vmul.f32 %v930_v50, %v913_v63  ;;  %v916_v45 = vmul.f32 %v908_v14, %v896_v58  ;;  %v943_v62 = vmul.f32 %v935_v9, %v915_v8  ;;  %v1011_v58 = vld [vmem:[%s2579_s2 + $0x10] sm:$0xff] }
 0x31f   :  { %v910_v44 = vmul.f32 %v908_v14, %v890_v48  ;;  %v912_v7 = vmul.f32 %v908_v14, %v892_v2  ;;  %v939_v43 = vmul.f32 %v925_v53, %v911_v10  ;;  %v937_v59 = vmul.f32 %v920_v55, %v909_v13 }
 0x320   :  { %v942_v0 = vmul.f32 %v930_v50, %v914_v47  ;;  %v944_v61 = vmul.f32 %v935_v9, %v916_v45  ;;  %v967_v15 = vadd.f32 %v959_v3, %v943_v62  ;;  %v965_v49 = vadd.f32 %v955_v12, %v941_v46  ;;  %v983_v47 = vpop.permute.xlu0 %982  ;;  %v979_v45 = vpop.permute.xlu1 %978  ;;  %v1009_v9 = vld [vmem:[%s2579_s2] sm:$0xff] }
 0x321   :  { %v938_v42 = vmul.f32 %v920_v55, %v910_v44  ;;  %v940_v16 = vmul.f32 %v925_v53, %v912_v7  ;;  %v963_v11 = vadd.f32 %v951_v1, %v939_v43  ;;  %v961_v2 = vadd.f32 %v947_v56, %v937_v59 }
 0x322   :  { %v966_v6 = vadd.f32 %v955_v12, %v942_v0  ;;  %v968_v41 = vadd.f32 %v959_v3, %v944_v61  ;;  %v999_v5 = vmul.f32 %v991_v51, %v967_v15  ;;  %vm975_vm9 = vcmp.ge.f32.partialorder %v967_v15, 0.0 }
 0x323   :  { %v964_v54 = vadd.f32 %v951_v1, %v940_v16  ;;  %v962_v57 = vadd.f32 %v947_v56, %v938_v42  ;;  %v997_v14 = vmul.f32 %v987_v4, %v965_v49  ;;  %vm973_vm11 = vcmp.ge.f32.partialorder %v965_v49, 0.0  ;;  %v1010_v1 = vld [vmem:[%s2579_s2 + $0x8] sm:$0xff] }
 0x324   :  { %v1000_v63 = vmul.f32 %v991_v51, %v968_v41  ;;  %v998_v8 = vmul.f32 %v987_v4, %v966_v6  ;;  %vm976_vm8 = vcmp.ge.f32.partialorder %v968_v41, 0.0  ;;  %vm974_vm10 = vcmp.ge.f32.partialorder %v966_v6, 0.0  ;;  %v2634_v51 = vld [vmem:[#allocation2_spill] sm:$0xff] }
 0x325   :  { %v996_v50 = vmul.f32 %v983_v47, %v964_v54  ;;  %v995_v44 = vmul.f32 %v983_v47, %v963_v11  ;;  %v1007_v13 = vsel %vm975_vm9, %v967_v15, %v999_v5  ;;  %vm972_vm12 = vcmp.ge.f32.partialorder %v964_v54, 0.0 }
 0x326   :  { %v1008_v46 = vsel %vm976_vm8, %v968_v41, %v1000_v63  ;;  %v994_v43 = vmul.f32 %v979_v45, %v962_v57  ;;  %v1006_v53 = vsel %vm974_vm10, %v966_v6, %v998_v8  ;;  %vm971_vm13 = vcmp.ge.f32.partialorder %v963_v11, 0.0 }
 0x327   :  { %1065 = vmatprep.subr.mxu1 %v1008_v46  ;;  %v993_v42 = vmul.f32 %v979_v45, %v961_v2  ;;  %v1005_v55 = vsel %vm973_vm11, %v965_v49, %v997_v14  ;;  %vm970_vm14 = vcmp.ge.f32.partialorder %v962_v57, 0.0  ;;  %v1004_v56 = vsel %vm972_vm12, %v964_v54, %v996_v50 }
 0x328   :  { %1066 = vmatpush1.msra.mxu1 %v1007_v13  ;;  %vm969_vm15 = vcmp.ge.f32.partialorder %v961_v2, 0.0  ;;  %v1003_v3 = vsel %vm971_vm13, %v963_v11, %v995_v44  ;;  %v1002_v41 = vsel %vm970_vm14, %v962_v57, %v994_v43 }
 0x329   :  { %1067 = vmatprep.subr.mxu1 %v1006_v53  ;;  %v1001_v12 = vsel %vm969_vm15, %v961_v2, %v993_v42 }
 0x32a   :  { %1068 = vmatpush1.msra.mxu1 %v1005_v55 }
 0x32b   :  { %1069 = vmatprep.subr.mxu1 %v1004_v56 }
 0x32c   :  { %1070 = vmatpush1.msra.mxu1 %v1003_v3 }
 0x32d   :  { %1071 = vmatprep.subr.mxu1 %v1002_v41 }
 0x32e   :  { %1072 = vmatpush1.msra.mxu1 %v1001_v12 }
 0x32f   :  { %1608 = vmatmul.mubr.msk.f32.vlgmr.msra.gmra.mxu1 %vm112_vm0, %v1009_v9  ;;  %1719 = vmatprep.subr.mxu1 %v2634_v51 }
 0x330   :  { %1111 = vmatprep.mubr.f32.mxu1 %v2621_v60  ;;  %1720 = vmatpush3.msra.mxu1 %v1982_v17  ;;  %v1012_v17 = vld [vmem:[%s2579_s2 + $0x18] sm:$0xff] }
 0x331   :  { %1721 = vmatprep.subr.mxu1 %v1989_v18  ;;  %v2635_v18 = vld [vmem:[#allocation3_spill] sm:$0xff] }
 0x332   :  { %1722 = vmatpush3.msra.mxu1 %v1996_v19  ;;  %v2636_v19 = vld [vmem:[#allocation4_spill] sm:$0xff] }
 0x333   :  { %1609 = vmatmul.mubr.msk.f32.gmra.mxu1 %vm112_vm0, %v1010_v1  ;;  %1723 = vmatprep.subr.mxu1 %v2003_v20  ;;  %v2637_v20 = vld [vmem:[#allocation5_spill] sm:$0xff] }
 0x334   :  { %1117 = vmatprep.mubr.f32.mxu1 %v2621_v60  ;;  %1724 = vmatpush3.msra.mxu1 %v2010_v21  ;;  %v2638_v21 = vld [vmem:[#allocation6_spill] sm:$0xff] }
 0x335   :  { %1725 = vmatprep.subr.mxu1 %v2018_v22  ;;  %v2639_v22 = vld [vmem:[#allocation7_spill] sm:$0xff] }
 0x336   :  { %1726 = vmatpush3.msra.mxu1 %v2024_v23  ;;  %v2640_v23 = vld [vmem:[#allocation8_spill] sm:$0xff] }
 0x337   :  { %1610 = vmatmul.mubr.msk.f32.gmra.mxu1 %vm112_vm0, %v1011_v58  ;;  %1727 = vmatprep.subr.mxu1 %v2031_v24  ;;  %v2641_v24 = vld [vmem:[#allocation9_spill] sm:$0xff] }
 0x338   :  { %1123 = vmatprep.mubr.f32.mxu1 %v2621_v60  ;;  %1728 = vmatpush3.msra.mxu1 %v2038_v25  ;;  %v2642_v25 = vld [vmem:[#allocation12_spill] sm:$0xff] }
 0x339   :  { %1729 = vmatprep.subr.mxu1 %v2045_v26 }
 0x33a   :  { %1730 = vmatpush3.msra.mxu1 %v2052_v27  ;;  %v1019_v27 = vpop.permute.xlu1 %1018 }
 0x33b   :  { %1611 = vmatmul.mubr.msk.f32.gmra.mxu1 %vm112_vm0, %v1012_v17  ;;  %1731 = vmatprep.subr.mxu1 %v2059_v28 }
 0x33c   :  { %1732 = vmatpush3.msra.mxu1 %v2066_v29  ;;  %v1015_v29 = vpop.permute.xlu0 %1014 }
 0x33d   :  { %1733 = vmatprep.subr.mxu1 %v2073_v30 }
 0x33e   :  { %1734 = vmatpush3.msra.mxu1 %v2080_v31 }
 0x33f   :  { %1735 = vmatprep.subr.mxu1 %v2087_v32 }
 0x340   :  { %1736 = vmatpush3.msra.mxu1 %v2094_v33  ;;  %v1027_v61 = vpop.permute.xlu0 %1026 }
 0x341   :  { %1737 = vmatprep.subr.mxu1 %v2101_v34  ;;  %v1023_v34 = vpop.permute.xlu1 %1022 }
 0x342   :  { %1738 = vmatpush3.msra.mxu1 %v2108_v35 }
 0x343   :  { %1739 = vmatprep.subr.mxu1 %v2115_v36 }
 0x344   :  { %1740 = vmatpush3.msra.mxu1 %v2122_v37 }
 0x345   :  { %1741 = vmatprep.subr.mxu1 %v2129_v38 }
 0x346   :  { %1742 = vmatpush3.msra.mxu1 %v2136_v39 }
 0x347   :  { %1743 = vmatprep.subr.mxu1 %v2143_v40 }
 0x348   :  { %1744 = vmatpush3.msra.mxu1 %v2635_v18 }
 0x349   :  { %1745 = vmatprep.subr.mxu1 %v2636_v19 }
 0x34a   :  { %1746 = vmatpush3.msra.mxu1 %v2637_v20 }
 0x34b   :  { %1747 = vmatprep.subr.mxu1 %v2638_v21 }
 0x34c   :  { %1748 = vmatpush3.msra.mxu1 %v2639_v22 }
 0x34d   :  { %1749 = vmatprep.subr.mxu1 %v2640_v23 }
 0x34e   :  { %1750 = vmatpush3.msra.mxu1 %v2641_v24 }
 0x34f   :  { %1421 = vmatprep.subr.mxu1 %v2642_v25 }
 0x3ef   :  { %v1107_v26 = vpop.f32.mrf.mxu1 }
 0x3f0   :  { %v2456_v32 = vadd.f32 %v1107_v26, %v1015_v29 }
 0x3f1   :  { %v1109_v28 = vpop.f32.mrf.mxu1 }
 0x3f2   :  { %v2460_v36 = vadd.f32 %v1109_v28, %v1015_v29  ;;  %v1148_v40 = vmul.f32 %v2456_v32, %v2456_v32  ;;  %v2644_v28 = vld [vmem:[#allocation14_spill] sm:$0xff]  ;;  %v2645_v29 = vld [vmem:[#allocation15_spill] sm:$0xff] }
 0x3f3   :  { %v1113_v30 = vpop.f32.mrf.mxu1 }
 0x3f4   :  { %v2454_v31 = vadd.f32 %v1113_v30, %v1019_v27  ;;  %v1149_v4 = vmul.f32 %v2460_v36, %v2460_v36  ;;  %v1799_v30 = vmov 4  }
 0x3f5   :  { %v1115_v33 = vpop.f32.mrf.mxu1  ;;  %1772 = vset.pattern.permute.xlu1 %v1799_v30  ;;  %1773 = vset.pattern.permute.xlu0 %v1799_v30 }
 0x3f6   :  { %v2458_v35 = vadd.f32 %v1115_v33, %v1019_v27  ;;  %v1150_v37 = vmul.f32 %v2454_v31, %v2454_v31  ;;  %v1130_v10 = vadd.f32 %v2454_v31, %v2456_v32  ;;  %v2643_v27 = vld [vmem:[#allocation13_spill] sm:$0xff]  ;;  %v2646_v33 = vld [vmem:[#allocation19_spill] sm:$0xff] }
 0x3f7   :  { %v1119_v38 = vpop.f32.mrf.mxu1  ;;  %1507 = vperm.xlu1 %1772, %v2646_v33  }
 0x3f8   :  { %v2464_v39 = vadd.f32 %v1119_v38, %v1023_v34  ;;  %v1151_v48 = vmul.f32 %v2458_v35, %v2458_v35  ;;  %v1156_v0 = vadd.f32 %v1150_v37, %v1148_v40  ;;  %v1139_v49 = vadd.f32 %v2458_v35, %v2460_v36  ;;  %v2648_v37 = vld [vmem:[#allocation16_spill] sm:$0xff]  ;;  %v2649_v40 = vld [vmem:[#allocation17_spill] sm:$0xff] }
 0x3f9   :  { %v1121_v52 = vpop.f32.mrf.mxu1  ;;  %v1800_v38 = vmov 5  }
 0x3fa   :  { %v1152_v62 = vmul.f32 %v2464_v39, %v2464_v39  ;;  %v2474_v7 = vadd.f32 %v1121_v52, %v1023_v34  ;;  %v1131_v59 = vadd.f32 %v1130_v10, %v2464_v39  ;;  %v1165_v11 = vadd.f32 %v1151_v48, %v1149_v4  ;;  %v2647_v34 = vld [vmem:[#allocation18_spill] sm:$0xff] }
 0x3fb   :  { %v1125_v15 = vpop.f32.mrf.mxu1  ;;  %1511 = vperm.xlu0 %1773, %v2647_v34   ;;  %1515 = vperm.xlu1 %1772, %v2648_v37  }
 0x3fc   :  { %v1153_v16 = vmul.f32 %v2474_v7, %v2474_v7  ;;  %v2483_v6 = vadd.f32 %v1125_v15, %v1027_v61  ;;  %v1157_v54 = vadd.f32 %v1156_v0, %v1152_v62  ;;  %v1140_v57 = vadd.f32 %v1139_v49, %v2474_v7 }
 0x3fd   :  { %v1127_v5 = vpop.f32.mrf.mxu1 }
 0x3fe   :  { %v1132_v63 = vadd.f32 %v1131_v59, %v2483_v6  ;;  %v1154_v8 = vmul.f32 %v2483_v6, %v2483_v6  ;;  %v2489_v2 = vadd.f32 %v1127_v5, %v1027_v61  ;;  %v1166_v14 = vadd.f32 %v1165_v11, %v1153_v16 }
 0x3ff   :  { %1774 = vset.pattern.permute.xlu0 %v1800_v38  ;;  %1519 = vperm.xlu1 %1772, %v2649_v40  }
 0x400   :  { %v1133_v47 = vrot.slane %v1132_v63, 4  ;;  %v1158_v45 = vadd.f32 %v1157_v54, %v1154_v8  ;;  %v1141_v50 = vadd.f32 %v1140_v57, %v2489_v2  ;;  %v1155_v46 = vmul.f32 %v2489_v2, %v2489_v2  ;;  %1531 = vperm.xlu0 %1774, %v2646_v33  }
 0x402   :  { %v1134_v44 = vadd.f32 %v1133_v47, %v1132_v63  ;;  %v1159_v13 = vrot.slane %v1158_v45, 4  ;;  %v1142_v43 = vrot.slane %v1141_v50, 4  ;;  %v1167_v53 = vadd.f32 %v1166_v14, %v1155_v46 }
 0x403   :  { %1775 = vset.pattern.permute.xlu1 %v1800_v38 }
 0x404   :  { %v1135_v42 = vrot.slane %v1134_v44, 2  ;;  %v1160_v55 = vadd.f32 %v1159_v13, %v1158_v45  ;;  %v1143_v56 = vadd.f32 %v1142_v43, %v1141_v50  ;;  %v1168_v3 = vrot.slane %v1167_v53, 4  ;;  %1543 = vperm.xlu0 %1774, %v2649_v40   ;;  %1535 = vperm.xlu1 %1775, %v2647_v34   ;;  %v2650_v13 = vld [vmem:[#allocation20_spill] sm:$0xff] }
 0x406   :  { %v1136_v41 = vadd.f32 %v1135_v42, %v1134_v44  ;;  %v1161_v9 = vrot.slane %v1160_v55, 2  ;;  %v1144_v12 = vrot.slane %v1143_v56, 2  ;;  %v1169_v51 = vadd.f32 %v1168_v3, %v1167_v53 }
 0x408   :  { %v1162_v1 = vadd.f32 %v1161_v9, %v1160_v55  ;;  %v1145_v58 = vadd.f32 %v1144_v12, %v1143_v56  ;;  %v1170_v17 = vrot.slane %v1169_v51, 2  ;;  %v1137_v18 = vrot.slane %v1136_v41, 1  ;;  %1539 = vperm.xlu1 %1775, %v2648_v37  }
 0x40a   :  { %v1146_v19 = vrot.slane %v1145_v58, 1  ;;  %v1171_v20 = vadd.f32 %v1170_v17, %v1169_v51  ;;  %v1163_v21 = vrot.slane %v1162_v1, 1  ;;  %v1138_v24 = vadd.f32 %v1137_v18, %v1136_v41 }
 0x40c   :  { %v1147_v22 = vadd.f32 %v1146_v19, %v1145_v58  ;;  %v1172_v23 = vrot.slane %v1171_v20, 1  ;;  %v1164_v26 = vadd.f32 %v1163_v21, %v1162_v1 }
 0x40e   :  { %1238 = vmatprep.mubr.f32.mxu0 %v1147_v22  ;;  %v1173_v25 = vadd.f32 %v1172_v23, %v1171_v20 }
 0x40f   :  { %1239 = vmatmul.mubr.f32.vlgmr.msra.gmra.mxu0 %v1138_v24 }
 0x410   :  { %1309 = vmatprep.mubr.f32.mxu1 %v1173_v25  ;;  %1348 = vmatpush1.msra.mxu0 %v2643_v27 }
 0x411   :  { %1310 = vmatmul.mubr.f32.vlgmr.msra.gmra.mxu1 %v1164_v26  ;;  %1349 = vmatprep.subr.mxu0 %v2644_v28 }
 0x412   :  { %1350 = vmatpush1.msra.mxu0 %v2645_v29  ;;  %1383 = vmatprep.mubr.f32.mxu0 %v2621_v60 }
 0x413   :  { %1422 = vmatpush1.msra.mxu1 %v2643_v27  ;;  %1457 = vmatprep.mubr.f32.mxu1 %v2621_v60 }
 0x414   :  { %1423 = vmatprep.subr.mxu1 %v2644_v28 }
 0x415   :  { %1424 = vmatpush1.msra.mxu1 %v2645_v29 }
 0x472   :  { %v1508_v8 = vpop.permute.xlu1 %1507 }
 0x476   :  { %v1516_v50 = vpop.permute.xlu1 %1515  ;;  %v1512_v46 = vpop.permute.xlu0 %1511 }
 0x47a   :  { %v1520_v44 = vpop.permute.xlu1 %1519 }
 0x47b   :  { %v1532_v12 = vpop.permute.xlu0 %1531 }
 0x47f   :  { %v1536_v55 = vpop.permute.xlu1 %1535  ;;  %v1544_v34 = vpop.permute.xlu0 %1543 }
 0x483   :  { %v1540_v28 = vpop.permute.xlu1 %1539 }
 0x4cf   :  { %v1716_v60 = vpop.f32.mrf.mxu0 }
 0x4d1   :  { %v1717_v48 = vpop.f32.mrf.mxu0  ;;  %v1751_v52 = vpop.f32.mrf.mxu1 }
 0x4d2   :  { %v1718_v10 = vadd.f32 %v1717_v48, %v1716_v60  ;;  %v1784_v60 = vld [vmem:[%s2572_s0] sm:$0xff] }
 0x4d3   :  { %v1752_v62 = vpop.f32.mrf.mxu1 }
 0x4d4   :  { %v1244_v4 = vmul.f32 0.001953125, %v1718_v10  ;;  %v1753_v0 = vadd.f32 %v1752_v62, %v1751_v52  ;;  %v1785_v10 = vld [vmem:[%s2572_s0 + $0x20] sm:$0xff] }
 0x4d6   :  { %v1315_v61 = vmul.f32 0.001953125, %v1753_v0  ;;  %1612 = vmatmul.mubr.msk.f32.vlgmr.msra.gmra.mxu0 %vm726_vm7, %v1244_v4  ;;  %v1786_v0 = vld [vmem:[%s2572_s0 + $0x10] sm:$0xff] }
 0x4d8   :  { %1613 = vmatmul.mubr.msk.f32.vlgmr.msra.gmra.mxu1 %vm726_vm7, %v1315_v61 }
 0x596   :  { %v1385_v15 = vpop.f32.mrf.mxu0 }
 0x597   :  { %v1464_v49 = vmul.f32 %v1385_v15, %v1385_v15  ;;  %v1473_v43 = vrot.slane %v1385_v15, %v2650_v13 }
 0x598   :  { %v1387_v59 = vpop.f32.mrf.mxu0  ;;  %v1459_v16 = vpop.f32.mrf.mxu1 }
 0x599   :  { %v1465_v11 = vmul.f32 %v1387_v59, %v1387_v59  ;;  %v1466_v54 = vsub.f32 %v1459_v16, %v1464_v49  ;;  %v1477_v53 = vrot.slane %v1387_v59, %v2650_v13  ;;  %v1478_v56 = vsub.f32 %v2456_v32, %v1473_v43  ;;  %v1787_v49 = vld [vmem:[%s2572_s0 + $0x30] sm:$0xff]  ;;  %v1788_v16 = vld [vmem:[%s2572_s0 + $0x8] sm:$0xff] }
 0x59a   :  { %v1461_v5 = vpop.f32.mrf.mxu1  ;;  %v1482_v41 = vsub.f32 %v2464_v39, %v1473_v43  ;;  %v1484_v9 = vsub.f32 %v2483_v6, %v1473_v43  ;;  %v1480_v17 = vsub.f32 %v2454_v31, %v1473_v43 }
 0x59b   :  { %v1468_v57 = vmax.f32 %v1466_v54, 0.0  ;;  %v1467_v63 = vsub.f32 %v1461_v5, %v1465_v11  ;;  %v1479_v1 = vsub.f32 %v2460_v36, %v1477_v53  ;;  %v1483_v58 = vsub.f32 %v2474_v7, %v1477_v53  ;;  %v1789_v5 = vld [vmem:[%s2572_s0 + $0x28] sm:$0xff] }
 0x59c   :  { %v1485_v32 = vsub.f32 %v2489_v2, %v1477_v53  ;;  %v1481_v22 = vsub.f32 %v2458_v35, %v1477_v53 }
 0x59d   :  { %v1486_v14 = vadd.f32 1e-05, %v1468_v57  ;;  %v1469_v47 = vmax.f32 %v1467_v63, 0.0 }
 0x59f   :  { %1780 = vrsqrt.f32 %v1486_v14  ;;  %v1487_v45 = vadd.f32 1e-05, %v1469_v47 }
 0x5a1   :  { %1782 = vrsqrt.f32 %v1487_v45  ;;  %v1791_v45 = vld [vmem:[%s2572_s0 + $0x38] sm:$0xff] }
 0x5ac   :  { %v1781_v42 = vpop.eup %1780 }
 0x5ad   :  { %v1493_v3 = vrot.slane %v1781_v42, %v2650_v13 }
 0x5ae   :  { %v1783_v51 = vpop.eup %1782 }
 0x5af   :  { %v1497_v18 = vrot.slane %v1783_v51, %v2650_v13  ;;  %v1498_v19 = vmul.f32 %v1493_v3, %v1478_v56  ;;  %v1502_v20 = vmul.f32 %v1493_v3, %v1482_v41  ;;  %v1504_v21 = vmul.f32 %v1493_v3, %v1484_v9 }
 0x5b0   :  { %v1500_v39 = vmul.f32 %v1493_v3, %v1480_v17 }
 0x5b1   :  { %v1499_v23 = vmul.f32 %v1497_v18, %v1479_v1  ;;  %v1522_v6 = vmul.f32 %v1508_v8, %v1498_v19  ;;  %v1503_v24 = vmul.f32 %v1497_v18, %v1483_v58  ;;  %v1526_v25 = vmul.f32 %v1516_v50, %v1502_v20 }
 0x5b2   :  { %v1505_v26 = vmul.f32 %v1497_v18, %v1485_v32  ;;  %v1528_v36 = vmul.f32 %v1520_v44, %v1504_v21  ;;  %v1501_v27 = vmul.f32 %v1497_v18, %v1481_v22  ;;  %v1524_v7 = vmul.f32 %v1512_v46, %v1500_v39 }
 0x5b3   :  { %v1523_v31 = vmul.f32 %v1508_v8, %v1499_v23  ;;  %v1527_v29 = vmul.f32 %v1516_v50, %v1503_v24  ;;  %v1546_v30 = vadd.f32 %v1532_v12, %v1522_v6  ;;  %v1550_v33 = vadd.f32 %v1540_v28, %v1526_v25  ;;  %v1790_v8 = vld [vmem:[%s2572_s0 + $0x18] sm:$0xff] }
 0x5b4   :  { %v1529_v37 = vmul.f32 %v1520_v44, %v1505_v26  ;;  %v1525_v38 = vmul.f32 %v1512_v46, %v1501_v27  ;;  %v1548_v2 = vadd.f32 %v1536_v55, %v1524_v7  ;;  %v1552_v40 = vadd.f32 %v1544_v34, %v1528_v36 }
 0x5b5   :  { %v1547_v35 = vadd.f32 %v1532_v12, %v1523_v31  ;;  %v1554_v48 = vadd.f32 %v1784_v60, %v1546_v30  ;;  %v1551_v52 = vadd.f32 %v1540_v28, %v1527_v29  ;;  %v1558_v62 = vadd.f32 %v1785_v10, %v1550_v33 }
 0x5b6   :  { %v1549_v4 = vadd.f32 %v1536_v55, %v1525_v38  ;;  %v1556_v61 = vadd.f32 %v1786_v0, %v1548_v2  ;;  %v1553_v15 = vadd.f32 %v1544_v34, %v1529_v37  ;;  %v1560_v59 = vadd.f32 %v1787_v49, %v1552_v40 }
 0x5b7   :  { %v1555_v11 = vadd.f32 %v1788_v16, %v1547_v35  ;;  %v1562_v54 = vmul.f32 0.70710677, %v1554_v48  ;;  %v1559_v57 = vadd.f32 %v1789_v5, %v1551_v52  ;;  %v1566_v63 = vmul.f32 0.70710677, %v1558_v62 }
 0x5b8   :  { %v1557_v14 = vadd.f32 %v1790_v8, %v1549_v4  ;;  %v1564_v47 = vmul.f32 0.70710677, %v1556_v61  ;;  %v1561_v50 = vadd.f32 %v1791_v45, %v1553_v15  ;;  %v1568_v46 = vmul.f32 0.70710677, %v1560_v59 }
 0x5b9   :  { %v1563_v44 = vmul.f32 0.70710677, %v1555_v11  ;;  %1570 = vst [vmem:[%s2580_s8] sm:$0xff] %v1562_v54  ;;  %v1567_v13 = vmul.f32 0.70710677, %v1559_v57  ;;  %1574 = vst [vmem:[%s2580_s8 + $0x20] sm:$0xff] %v1566_v63 }
 0x5ba   :  { %v1565_v43 = vmul.f32 0.70710677, %v1557_v14  ;;  %1572 = vst [vmem:[%s2580_s8 + $0x10] sm:$0xff] %v1564_v47  ;;  %v1569_v53 = vmul.f32 0.70710677, %v1561_v50  ;;  %1576 = vst [vmem:[%s2580_s8 + $0x30] sm:$0xff] %v1568_v46 }
 0x5bb   :  { %1571 = vst [vmem:[%s2580_s8 + $0x8] sm:$0xff] %v1563_v44  ;;  %1575 = vst [vmem:[%s2580_s8 + $0x28] sm:$0xff] %v1567_v13 }
 0x5bc   :  { %1573 = vst [vmem:[%s2580_s8 + $0x18] sm:$0xff] %v1565_v43  ;;  %1577 = vst [vmem:[%s2580_s8 + $0x38] sm:$0xff] %v1569_v53 }

</bundles_post_ra>
